<compile_context>
chip_gen: v5e
topology: v5e:2x2
jax: 0.10.0
libtpu: 0.0.40
codegen_flags: <defaults>
</compile_context>

<pallas_src>
import math
import functools

import jax
import jax.numpy as jnp
from jax import lax
from jax.experimental import pallas as pl
from jax.experimental.pallas import tpu as pltpu


# ----------------------------------------------------------------------------- fused kernel

def _decoder_layer_kernel(dec_ref, enc_ref,
                          wq1_ref, wk1_ref, wv1_ref, fc1_ref,
                          wq2_ref, wk2_ref, wv2_ref, fc2_ref,
                          w1_ref, b1_ref, w2_ref, b2_ref,
                          out_ref, attn1_ref, attn2_ref,
                          *, n_heads, d_k, d_v, eps):
    """One grid step = one batch element. All weights resident in VMEM."""
    x = dec_ref[0]        # (Lq, D)
    enc = enc_ref[0]      # (Lk, D)
    scale = 1.0 / math.sqrt(d_k)

    def add_layernorm(a, b):
        z = a + b                                   # broadcasts (1, D) rows if needed
        mu = jnp.mean(z, axis=-1, keepdims=True)
        var = jnp.mean((z - mu) ** 2, axis=-1, keepdims=True)
        return (z - mu) * lax.rsqrt(var + eps)

    def mha(x_q, x_kv, wq_ref, wk_ref, wv_ref, fc_ref, attn_ref):
        # projections stay in (L, H*d) layout; heads are static lane slices
        q = jnp.dot(x_q, wq_ref[...], preferred_element_type=jnp.float32)    # (Lq, H*dk)
        k = jnp.dot(x_kv, wk_ref[...], preferred_element_type=jnp.float32)   # (Lk, H*dk)
        v = jnp.dot(x_kv, wv_ref[...], preferred_element_type=jnp.float32)   # (Lk, H*dv)

        # per-head scores -> softmax (attention maps are module outputs); unrolled loop
        for h in range(n_heads):
            qh = q[:, h * d_k:(h + 1) * d_k]                                 # (Lq, dk)
            kh = k[:, h * d_k:(h + 1) * d_k]                                 # (Lk, dk)
            s = lax.dot_general(qh, kh, (((1,), (1,)), ((), ())),
                                preferred_element_type=jnp.float32) * scale  # (Lq, Lk)
            s = s - jnp.max(s, axis=-1, keepdims=True)
            e = jnp.exp(s)
            attn_ref[0, h, :, :] = e / jnp.sum(e, axis=-1, keepdims=True)

        # einsum('bhqk,bhvd->bhqd', attn, V) == (sum_k attn) * (sum_v V) == broadcast(sum_v V)
        v_sum = jnp.sum(v, axis=0, keepdims=True)                            # (1, H*dv)
        # output projection of the (identical) context row; broadcast via the residual add
        return jnp.dot(v_sum, fc_ref[...], preferred_element_type=jnp.float32)  # (1, D)

    o1 = add_layernorm(x, mha(x, x, wq1_ref, wk1_ref, wv1_ref, fc1_ref, attn1_ref))
    o2 = add_layernorm(o1, mha(o1, enc, wq2_ref, wk2_ref, wv2_ref, fc2_ref, attn2_ref))

    h1 = jnp.maximum(
        jnp.dot(o2, w1_ref[...], preferred_element_type=jnp.float32) + b1_ref[...], 0.0)
    ffn = jnp.dot(h1, w2_ref[...], preferred_element_type=jnp.float32) + b2_ref[...]
    out_ref[0] = add_layernorm(o2, ffn)


# ----------------------------------------------------------------------------- wrapper

def decoder_layer(dec_inputs, enc_outputs, prep, *, n_heads, d_k, d_v, eps=1e-5):
    """prep: parameters already in (Din, Dout) layout, biases as (1, N)."""
    B, Lq, D = dec_inputs.shape
    Lk = enc_outputs.shape[1]
    F = prep["w1"].shape[1]

    kern = functools.partial(_decoder_layer_kernel,
                             n_heads=n_heads, d_k=d_k, d_v=d_v, eps=eps)

    def wspec(shape):
        return pl.BlockSpec(shape, lambda b: (0, 0))   # weights resident across grid steps

    out3, attn1, attn2 = pl.pallas_call(
        kern,
        out_shape=(jax.ShapeDtypeStruct((B, Lq, D), jnp.float32),
                   jax.ShapeDtypeStruct((B, n_heads, Lq, Lq), jnp.float32),
                   jax.ShapeDtypeStruct((B, n_heads, Lq, Lk), jnp.float32)),
        grid=(B,),
        in_specs=[
            pl.BlockSpec((1, Lq, D), lambda b: (b, 0, 0)),     # dec_inputs
            pl.BlockSpec((1, Lk, D), lambda b: (b, 0, 0)),     # enc_outputs
            wspec((D, n_heads * d_k)),                         # WQ (self)
            wspec((D, n_heads * d_k)),                         # WK (self)
            wspec((D, n_heads * d_v)),                         # WV (self)
            wspec((n_heads * d_v, D)),                         # fc (self)
            wspec((D, n_heads * d_k)),                         # WQ (enc)
            wspec((D, n_heads * d_k)),                         # WK (enc)
            wspec((D, n_heads * d_v)),                         # WV (enc)
            wspec((n_heads * d_v, D)),                         # fc (enc)
            wspec((D, F)),                                     # w1
            wspec((1, F)),                                     # b1
            wspec((F, D)),                                     # w2
            wspec((1, D)),                                     # b2
        ],
        out_specs=(pl.BlockSpec((1, Lq, D), lambda b: (b, 0, 0)),
                   pl.BlockSpec((1, n_heads, Lq, Lq), lambda b: (b, 0, 0, 0)),
                   pl.BlockSpec((1, n_heads, Lq, Lk), lambda b: (b, 0, 0, 0))),
        compiler_params=pltpu.CompilerParams(dimension_semantics=("parallel",)),
    )(dec_inputs, enc_outputs,
      prep["self_attn"]["WQ"], prep["self_attn"]["WK"],
      prep["self_attn"]["WV"], prep["self_attn"]["fc"],
      prep["enc_attn"]["WQ"], prep["enc_attn"]["WK"],
      prep["enc_attn"]["WV"], prep["enc_attn"]["fc"],
      prep["w1"], prep["b1"], prep["w2"], prep["b2"])
    return out3, attn1, attn2


def prepare_params(params):
    """One-time (outside jit) re-layout: torch (Dout, Din) weights -> (Din, Dout);
    1-D biases -> (1, N)."""
    def mha_p(p):
        return {"WQ": p["WQ"].T, "WK": p["WK"].T, "WV": p["WV"].T, "fc": p["fc"].T}
    return {"self_attn": mha_p(params["self_attn"]),
            "enc_attn": mha_p(params["enc_attn"]),
            "w1": params["w1"].T, "b1": params["b1"].reshape(1, -1),
            "w2": params["w2"].T, "b2": params["b2"].reshape(1, -1)}


# ----------------------------------------------------------------------------- pure-JAX reference
# (literal semantics of the PyTorch module, torch-layout weights)

def _ref_mha(x_q, x_kv, p, n_heads, d_k, d_v):
    B, Lq, D = x_q.shape
    Lk = x_kv.shape[1]
    q = (x_q @ p["WQ"].T).reshape(B, Lq, n_heads, d_k).transpose(0, 2, 1, 3)
    k = (x_kv @ p["WK"].T).reshape(B, Lk, n_heads, d_k).transpose(0, 2, 1, 3)
    v = (x_kv @ p["WV"].T).reshape(B, Lk, n_heads, d_v).transpose(0, 2, 1, 3)
    scores = jnp.einsum("bhqd,bhkd->bhqk", q, k) / math.sqrt(d_k)
    attn = jax.nn.softmax(scores, axis=-1)
    ctx = jnp.einsum("bhqk,bhvd->bhqd", attn, v)   # same degenerate contraction as torch code
    ctx = ctx.transpose(0, 2, 1, 3).reshape(B, Lq, n_heads * d_v)
    return ctx @ p["fc"].T, attn


def _ref_ln(z, eps=1e-5):
    mu = jnp.mean(z, axis=-1, keepdims=True)
    var = jnp.mean((z - mu) ** 2, axis=-1, keepdims=True)
    return (z - mu) / jnp.sqrt(var + eps)


def _ref_decoder_layer(dec_inputs, enc_outputs, params, n_heads, d_k, d_v):
    out, a1 = _ref_mha(dec_inputs, dec_inputs, params["self_attn"], n_heads, d_k, d_v)
    out = _ref_ln(dec_inputs + out)
    out2, a2 = _ref_mha(out, enc_outputs, params["enc_attn"], n_heads, d_k, d_v)
    out2 = _ref_ln(out + out2)
    h = jnp.maximum(out2 @ params["w1"].T + params["b1"], 0.0)
    out3 = h @ params["w2"].T + params["b2"]
    out3 = _ref_ln(out2 + out3)
    return out3, a1, a2


# ----------------------------------------------------------------------------- init & main

def _init_params(key, d_model, d_ff, d_k, d_v, n_heads):
    ks = jax.random.split(key, 12)
    def w(k, shape, fan_in):
        return (jax.random.normal(k, shape, jnp.float32) / math.sqrt(fan_in)).astype(jnp.float32)
    mha_q = {"WQ": w(ks[0], (d_k * n_heads, d_model), d_model),
             "WK": w(ks[1], (d_k * n_heads, d_model), d_model),
             "WV": w(ks[2], (d_v * n_heads, d_model), d_model),
             "fc": w(ks[3], (d_model, n_heads * d_v), n_heads * d_v)}
    mha_e = {"WQ": w(ks[4], (d_k * n_heads, d_model), d_model),
             "WK": w(ks[5], (d_k * n_heads, d_model), d_model),
             "WV": w(ks[6], (d_v * n_heads, d_model), d_model),
             "fc": w(ks[7], (d_model, n_heads * d_v), n_heads * d_v)}
    return {"self_attn": mha_q,
            "enc_attn": mha_e,
            "w1": w(ks[8], (d_ff, d_model), d_model),
            "b1": 0.01 * jax.random.normal(ks[9], (d_ff,), jnp.float32),
            "w2": w(ks[10], (d_model, d_ff), d_ff),
            "b2": 0.01 * jax.random.normal(ks[11], (d_model,), jnp.float32)}


if __name__ == "__main__":
    d_model, d_ff, d_k, d_v, n_heads = 32, 64, 8, 8, 4
    B, L_dec, L_enc = 2, 8, 8

    key = jax.random.PRNGKey(0)
    k_dec, k_enc, k_par = jax.random.split(key, 3)
    dec_inputs = jax.random.normal(k_dec, (B, L_dec, d_model), jnp.float32)
    enc_outputs = jax.random.normal(k_enc, (B, L_enc, d_model), jnp.float32)
    params = _init_params(k_par, d_model, d_ff, d_k, d_v, n_heads)
    prep = prepare_params(params)   # one-time weight re-layout, outside jit

    fwd = jax.jit(functools.partial(decoder_layer, n_heads=n_heads, d_k=d_k, d_v=d_v))
    out3, dec_self_attn, dec_enc_attn = fwd(dec_inputs, enc_outputs, prep)
    jax.block_until_ready((out3, dec_self_attn, dec_enc_attn))

    # correctness vs. pure-JAX reference with the module's literal semantics
    r3, r1, r2 = _ref_decoder_layer(dec_inputs, enc_outputs, params, n_heads, d_k, d_v)
    assert out3.shape == (B, L_dec, d_model)
    assert dec_self_attn.shape == (B, n_heads, L_dec, L_dec)
    assert dec_enc_attn.shape == (B, n_heads, L_dec, L_enc)
    assert jnp.allclose(out3, r3, atol=1e-4, rtol=1e-4)
    assert jnp.allclose(dec_self_attn, r1, atol=1e-5, rtol=1e-5)
    assert jnp.allclose(dec_enc_attn, r2, atol=1e-5, rtol=1e-5)

    print("KERNEL_OK")
</pallas_src>

<mosaic_0001>
module attributes {stable_mosaic.version = 11 : i64} {
  func.func @_decoder_layer_kernel(%arg0: i32, %arg1: memref<1x8x32xf32, #tpu.memory_space<vmem>>, %arg2: memref<1x8x32xf32, #tpu.memory_space<vmem>>, %arg3: memref<32x32xf32, #tpu.memory_space<vmem>>, %arg4: memref<32x32xf32, #tpu.memory_space<vmem>>, %arg5: memref<32x32xf32, #tpu.memory_space<vmem>>, %arg6: memref<32x32xf32, #tpu.memory_space<vmem>>, %arg7: memref<32x32xf32, #tpu.memory_space<vmem>>, %arg8: memref<32x32xf32, #tpu.memory_space<vmem>>, %arg9: memref<32x32xf32, #tpu.memory_space<vmem>>, %arg10: memref<32x32xf32, #tpu.memory_space<vmem>>, %arg11: memref<32x64xf32, #tpu.memory_space<vmem>>, %arg12: memref<1x64xf32, #tpu.memory_space<vmem>>, %arg13: memref<64x32xf32, #tpu.memory_space<vmem>>, %arg14: memref<1x32xf32, #tpu.memory_space<vmem>>, %arg15: memref<1x8x32xf32, #tpu.memory_space<vmem>>, %arg16: memref<1x4x8x8xf32, #tpu.memory_space<vmem>>, %arg17: memref<1x4x8x8xf32, #tpu.memory_space<vmem>>) attributes {dimension_semantics = [#tpu.dimension_semantics<parallel>], iteration_bounds = array<i64: 2>, scalar_prefetch = 0 : i64, scratch_operands = 0 : i64, tpu.core_type = #tpu.core_type<tc>, window_params = [{transform_indices = @transform_0, window_bounds = array<i64: 1, 8, 32>}, {transform_indices = @transform_1, window_bounds = array<i64: 1, 8, 32>}, {pipeline_mode = #tpu.pipeline_mode<synchronous>, transform_indices = @transform_2, window_bounds = array<i64: 32, 32>}, {pipeline_mode = #tpu.pipeline_mode<synchronous>, transform_indices = @transform_3, window_bounds = array<i64: 32, 32>}, {pipeline_mode = #tpu.pipeline_mode<synchronous>, transform_indices = @transform_4, window_bounds = array<i64: 32, 32>}, {pipeline_mode = #tpu.pipeline_mode<synchronous>, transform_indices = @transform_5, window_bounds = array<i64: 32, 32>}, {pipeline_mode = #tpu.pipeline_mode<synchronous>, transform_indices = @transform_6, window_bounds = array<i64: 32, 32>}, {pipeline_mode = #tpu.pipeline_mode<synchronous>, transform_indices = @transform_7, window_bounds = array<i64: 32, 32>}, {pipeline_mode = #tpu.pipeline_mode<synchronous>, transform_indices = @transform_8, window_bounds = array<i64: 32, 32>}, {pipeline_mode = #tpu.pipeline_mode<synchronous>, transform_indices = @transform_9, window_bounds = array<i64: 32, 32>}, {pipeline_mode = #tpu.pipeline_mode<synchronous>, transform_indices = @transform_10, window_bounds = array<i64: 32, 64>}, {pipeline_mode = #tpu.pipeline_mode<synchronous>, transform_indices = @transform_11, window_bounds = array<i64: 1, 64>}, {pipeline_mode = #tpu.pipeline_mode<synchronous>, transform_indices = @transform_12, window_bounds = array<i64: 64, 32>}, {pipeline_mode = #tpu.pipeline_mode<synchronous>, transform_indices = @transform_13, window_bounds = array<i64: 1, 32>}, {transform_indices = @transform_14, window_bounds = array<i64: 1, 8, 32>}, {transform_indices = @transform_15, window_bounds = array<i64: 1, 4, 8, 8>}, {transform_indices = @transform_16, window_bounds = array<i64: 1, 4, 8, 8>}]} {
    %c0 = arith.constant 0 : index
    %c0_0 = arith.constant 0 : index
    %c0_1 = arith.constant 0 : index
    %0 = vector.load %arg1[%c0, %c0_0, %c0_1] : memref<1x8x32xf32, #tpu.memory_space<vmem>>, vector<1x8x32xf32>
    %1 = vector.shape_cast %0 : vector<1x8x32xf32> to vector<8x32xf32>
    %c0_2 = arith.constant 0 : index
    %c0_3 = arith.constant 0 : index
    %c0_4 = arith.constant 0 : index
    %2 = vector.load %arg2[%c0_2, %c0_3, %c0_4] : memref<1x8x32xf32, #tpu.memory_space<vmem>>, vector<1x8x32xf32>
    %3 = vector.shape_cast %2 : vector<1x8x32xf32> to vector<8x32xf32>
    %c0_5 = arith.constant 0 : index
    %c0_6 = arith.constant 0 : index
    %4 = vector.load %arg3[%c0_5, %c0_6] : memref<32x32xf32, #tpu.memory_space<vmem>>, vector<32x32xf32>
    %cst = arith.constant dense<0.000000e+00> : vector<8x32xf32>
    %5 = tpu.matmul %1, %4, %cst {dimension_numbers = #tpu.dot_dimension_numbers<[1], [0], [0], [1], [0, 0, 1, 1], [], []>} : vector<8x32xf32>, vector<32x32xf32>, vector<8x32xf32> -> vector<8x32xf32>
    %c0_7 = arith.constant 0 : index
    %c0_8 = arith.constant 0 : index
    %6 = vector.load %arg4[%c0_7, %c0_8] : memref<32x32xf32, #tpu.memory_space<vmem>>, vector<32x32xf32>
    %cst_9 = arith.constant dense<0.000000e+00> : vector<8x32xf32>
    %7 = tpu.matmul %1, %6, %cst_9 {dimension_numbers = #tpu.dot_dimension_numbers<[1], [0], [0], [1], [0, 0, 1, 1], [], []>} : vector<8x32xf32>, vector<32x32xf32>, vector<8x32xf32> -> vector<8x32xf32>
    %c0_10 = arith.constant 0 : index
    %c0_11 = arith.constant 0 : index
    %8 = vector.load %arg5[%c0_10, %c0_11] : memref<32x32xf32, #tpu.memory_space<vmem>>, vector<32x32xf32>
    %cst_12 = arith.constant dense<0.000000e+00> : vector<8x32xf32>
    %9 = tpu.matmul %1, %8, %cst_12 {dimension_numbers = #tpu.dot_dimension_numbers<[1], [0], [0], [1], [0, 0, 1, 1], [], []>} : vector<8x32xf32>, vector<32x32xf32>, vector<8x32xf32> -> vector<8x32xf32>
    %10 = vector.extract_strided_slice %5 {offsets = [0, 0], sizes = [8, 8], strides = [1, 1]} : vector<8x32xf32> to vector<8x8xf32>
    %11 = vector.extract_strided_slice %7 {offsets = [0, 0], sizes = [8, 8], strides = [1, 1]} : vector<8x32xf32> to vector<8x8xf32>
    %cst_13 = arith.constant dense<0.000000e+00> : vector<8x8xf32>
    %12 = tpu.matmul %10, %11, %cst_13 {dimension_numbers = #tpu.dot_dimension_numbers<[1], [1], [0], [0], [0, 0, 1, 0], [], []>} : vector<8x8xf32>, vector<8x8xf32>, vector<8x8xf32> -> vector<8x8xf32>
    %cst_14 = arith.constant 0.353553385 : f32
    %13 = vector.broadcast %cst_14 : f32 to vector<8x8xf32>
    %14 = arith.mulf %12, %13 : vector<8x8xf32>
    %cst_15 = arith.constant dense<0xFF800000> : vector<8xf32>
    %15 = vector.multi_reduction <maximumf>, %14, %cst_15 [1] : vector<8x8xf32> to vector<8xf32>
    %16 = vector.shape_cast %15 : vector<8xf32> to vector<8x1xf32>
    %17 = vector.broadcast %16 : vector<8x1xf32> to vector<8x8xf32>
    %18 = arith.subf %14, %17 : vector<8x8xf32>
    %19 = math.exp %18 : vector<8x8xf32>
    %cst_16 = arith.constant dense<0.000000e+00> : vector<8xf32>
    %20 = vector.multi_reduction <add>, %19, %cst_16 [1] : vector<8x8xf32> to vector<8xf32>
    %21 = vector.shape_cast %20 : vector<8xf32> to vector<8x1xf32>
    %22 = vector.broadcast %21 : vector<8x1xf32> to vector<8x8xf32>
    %23 = arith.divf %19, %22 : vector<8x8xf32>
    %c0_17 = arith.constant 0 : index
    %c0_18 = arith.constant 0 : index
    %c0_19 = arith.constant 0 : index
    %c0_20 = arith.constant 0 : index
    %24 = vector.load %arg16[%c0_17, %c0_18, %c0_19, %c0_20] : memref<1x4x8x8xf32, #tpu.memory_space<vmem>>, vector<1x1x8x8xf32>
    %25 = vector.shape_cast %24 : vector<1x1x8x8xf32> to vector<8x8xf32>
    %26 = vector.shape_cast %23 : vector<8x8xf32> to vector<1x1x8x8xf32>
    tpu.vector_store %arg16[%c0_17, %c0_18, %c0_19, %c0_20], %26 {strides = array<i32>} : memref<1x4x8x8xf32, #tpu.memory_space<vmem>>, vector<1x1x8x8xf32>,
    %27 = vector.extract_strided_slice %5 {offsets = [0, 8], sizes = [8, 8], strides = [1, 1]} : vector<8x32xf32> to vector<8x8xf32>
    %28 = vector.extract_strided_slice %7 {offsets = [0, 8], sizes = [8, 8], strides = [1, 1]} : vector<8x32xf32> to vector<8x8xf32>
    %cst_21 = arith.constant dense<0.000000e+00> : vector<8x8xf32>
    %29 = tpu.matmul %27, %28, %cst_21 {dimension_numbers = #tpu.dot_dimension_numbers<[1], [1], [0], [0], [0, 0, 1, 0], [], []>} : vector<8x8xf32>, vector<8x8xf32>, vector<8x8xf32> -> vector<8x8xf32>
    %cst_22 = arith.constant 0.353553385 : f32
    %30 = vector.broadcast %cst_22 : f32 to vector<8x8xf32>
    %31 = arith.mulf %29, %30 : vector<8x8xf32>
    %cst_23 = arith.constant dense<0xFF800000> : vector<8xf32>
    %32 = vector.multi_reduction <maximumf>, %31, %cst_23 [1] : vector<8x8xf32> to vector<8xf32>
    %33 = vector.shape_cast %32 : vector<8xf32> to vector<8x1xf32>
    %34 = vector.broadcast %33 : vector<8x1xf32> to vector<8x8xf32>
    %35 = arith.subf %31, %34 : vector<8x8xf32>
    %36 = math.exp %35 : vector<8x8xf32>
    %cst_24 = arith.constant dense<0.000000e+00> : vector<8xf32>
    %37 = vector.multi_reduction <add>, %36, %cst_24 [1] : vector<8x8xf32> to vector<8xf32>
    %38 = vector.shape_cast %37 : vector<8xf32> to vector<8x1xf32>
    %39 = vector.broadcast %38 : vector<8x1xf32> to vector<8x8xf32>
    %40 = arith.divf %36, %39 : vector<8x8xf32>
    %c0_25 = arith.constant 0 : index
    %c1 = arith.constant 1 : index
    %c0_26 = arith.constant 0 : index
    %c0_27 = arith.constant 0 : index
    %41 = vector.load %arg16[%c0_25, %c1, %c0_26, %c0_27] : memref<1x4x8x8xf32, #tpu.memory_space<vmem>>, vector<1x1x8x8xf32>
    %42 = vector.shape_cast %41 : vector<1x1x8x8xf32> to vector<8x8xf32>
    %43 = vector.shape_cast %40 : vector<8x8xf32> to vector<1x1x8x8xf32>
    tpu.vector_store %arg16[%c0_25, %c1, %c0_26, %c0_27], %43 {strides = array<i32>} : memref<1x4x8x8xf32, #tpu.memory_space<vmem>>, vector<1x1x8x8xf32>,
    %44 = vector.extract_strided_slice %5 {offsets = [0, 16], sizes = [8, 8], strides = [1, 1]} : vector<8x32xf32> to vector<8x8xf32>
    %45 = vector.extract_strided_slice %7 {offsets = [0, 16], sizes = [8, 8], strides = [1, 1]} : vector<8x32xf32> to vector<8x8xf32>
    %cst_28 = arith.constant dense<0.000000e+00> : vector<8x8xf32>
    %46 = tpu.matmul %44, %45, %cst_28 {dimension_numbers = #tpu.dot_dimension_numbers<[1], [1], [0], [0], [0, 0, 1, 0], [], []>} : vector<8x8xf32>, vector<8x8xf32>, vector<8x8xf32> -> vector<8x8xf32>
    %cst_29 = arith.constant 0.353553385 : f32
    %47 = vector.broadcast %cst_29 : f32 to vector<8x8xf32>
    %48 = arith.mulf %46, %47 : vector<8x8xf32>
    %cst_30 = arith.constant dense<0xFF800000> : vector<8xf32>
    %49 = vector.multi_reduction <maximumf>, %48, %cst_30 [1] : vector<8x8xf32> to vector<8xf32>
    %50 = vector.shape_cast %49 : vector<8xf32> to vector<8x1xf32>
    %51 = vector.broadcast %50 : vector<8x1xf32> to vector<8x8xf32>
    %52 = arith.subf %48, %51 : vector<8x8xf32>
    %53 = math.exp %52 : vector<8x8xf32>
    %cst_31 = arith.constant dense<0.000000e+00> : vector<8xf32>
    %54 = vector.multi_reduction <add>, %53, %cst_31 [1] : vector<8x8xf32> to vector<8xf32>
    %55 = vector.shape_cast %54 : vector<8xf32> to vector<8x1xf32>
    %56 = vector.broadcast %55 : vector<8x1xf32> to vector<8x8xf32>
    %57 = arith.divf %53, %56 : vector<8x8xf32>
    %c0_32 = arith.constant 0 : index
    %c2 = arith.constant 2 : index
    %c0_33 = arith.constant 0 : index
    %c0_34 = arith.constant 0 : index
    %58 = vector.load %arg16[%c0_32, %c2, %c0_33, %c0_34] : memref<1x4x8x8xf32, #tpu.memory_space<vmem>>, vector<1x1x8x8xf32>
    %59 = vector.shape_cast %58 : vector<1x1x8x8xf32> to vector<8x8xf32>
    %60 = vector.shape_cast %57 : vector<8x8xf32> to vector<1x1x8x8xf32>
    tpu.vector_store %arg16[%c0_32, %c2, %c0_33, %c0_34], %60 {strides = array<i32>} : memref<1x4x8x8xf32, #tpu.memory_space<vmem>>, vector<1x1x8x8xf32>,
    %61 = vector.extract_strided_slice %5 {offsets = [0, 24], sizes = [8, 8], strides = [1, 1]} : vector<8x32xf32> to vector<8x8xf32>
    %62 = vector.extract_strided_slice %7 {offsets = [0, 24], sizes = [8, 8], strides = [1, 1]} : vector<8x32xf32> to vector<8x8xf32>
    %cst_35 = arith.constant dense<0.000000e+00> : vector<8x8xf32>
    %63 = tpu.matmul %61, %62, %cst_35 {dimension_numbers = #tpu.dot_dimension_numbers<[1], [1], [0], [0], [0, 0, 1, 0], [], []>} : vector<8x8xf32>, vector<8x8xf32>, vector<8x8xf32> -> vector<8x8xf32>
    %cst_36 = arith.constant 0.353553385 : f32
    %64 = vector.broadcast %cst_36 : f32 to vector<8x8xf32>
    %65 = arith.mulf %63, %64 : vector<8x8xf32>
    %cst_37 = arith.constant dense<0xFF800000> : vector<8xf32>
    %66 = vector.multi_reduction <maximumf>, %65, %cst_37 [1] : vector<8x8xf32> to vector<8xf32>
    %67 = vector.shape_cast %66 : vector<8xf32> to vector<8x1xf32>
    %68 = vector.broadcast %67 : vector<8x1xf32> to vector<8x8xf32>
    %69 = arith.subf %65, %68 : vector<8x8xf32>
    %70 = math.exp %69 : vector<8x8xf32>
    %cst_38 = arith.constant dense<0.000000e+00> : vector<8xf32>
    %71 = vector.multi_reduction <add>, %70, %cst_38 [1] : vector<8x8xf32> to vector<8xf32>
    %72 = vector.shape_cast %71 : vector<8xf32> to vector<8x1xf32>
    %73 = vector.broadcast %72 : vector<8x1xf32> to vector<8x8xf32>
    %74 = arith.divf %70, %73 : vector<8x8xf32>
    %c0_39 = arith.constant 0 : index
    %c3 = arith.constant 3 : index
    %c0_40 = arith.constant 0 : index
    %c0_41 = arith.constant 0 : index
    %75 = vector.load %arg16[%c0_39, %c3, %c0_40, %c0_41] : memref<1x4x8x8xf32, #tpu.memory_space<vmem>>, vector<1x1x8x8xf32>
    %76 = vector.shape_cast %75 : vector<1x1x8x8xf32> to vector<8x8xf32>
    %77 = vector.shape_cast %74 : vector<8x8xf32> to vector<1x1x8x8xf32>
    tpu.vector_store %arg16[%c0_39, %c3, %c0_40, %c0_41], %77 {strides = array<i32>} : memref<1x4x8x8xf32, #tpu.memory_space<vmem>>, vector<1x1x8x8xf32>,
    %cst_42 = arith.constant dense<0.000000e+00> : vector<32xf32>
    %78 = vector.multi_reduction <add>, %9, %cst_42 [0] : vector<8x32xf32> to vector<32xf32>
    %79 = vector.shape_cast %78 : vector<32xf32> to vector<1x32xf32>
    %c0_43 = arith.constant 0 : index
    %c0_44 = arith.constant 0 : index
    %80 = vector.load %arg6[%c0_43, %c0_44] : memref<32x32xf32, #tpu.memory_space<vmem>>, vector<32x32xf32>
    %cst_45 = arith.constant dense<0.000000e+00> : vector<1x32xf32>
    %81 = tpu.matmul %79, %80, %cst_45 {dimension_numbers = #tpu.dot_dimension_numbers<[1], [0], [0], [1], [0, 0, 1, 1], [], []>} : vector<1x32xf32>, vector<32x32xf32>, vector<1x32xf32> -> vector<1x32xf32>
    %82 = vector.broadcast %81 : vector<1x32xf32> to vector<8x32xf32>
    %83 = arith.addf %1, %82 : vector<8x32xf32>
    %cst_46 = arith.constant dense<0.000000e+00> : vector<8xf32>
    %84 = vector.multi_reduction <add>, %83, %cst_46 [1] : vector<8x32xf32> to vector<8xf32>
    %85 = vector.shape_cast %84 : vector<8xf32> to vector<8x1xf32>
    %cst_47 = arith.constant 3.200000e+01 : f32
    %86 = vector.broadcast %cst_47 : f32 to vector<8x1xf32>
    %87 = arith.divf %85, %86 : vector<8x1xf32>
    %88 = vector.broadcast %87 : vector<8x1xf32> to vector<8x32xf32>
    %89 = arith.subf %83, %88 : vector<8x32xf32>
    %90 = arith.mulf %89, %89 : vector<8x32xf32>
    %cst_48 = arith.constant dense<0.000000e+00> : vector<8xf32>
    %91 = vector.multi_reduction <add>, %90, %cst_48 [1] : vector<8x32xf32> to vector<8xf32>
    %92 = vector.shape_cast %91 : vector<8xf32> to vector<8x1xf32>
    %cst_49 = arith.constant 3.200000e+01 : f32
    %93 = vector.broadcast %cst_49 : f32 to vector<8x1xf32>
    %94 = arith.divf %92, %93 : vector<8x1xf32>
    %95 = vector.broadcast %87 : vector<8x1xf32> to vector<8x32xf32>
    %96 = arith.subf %83, %95 : vector<8x32xf32>
    %cst_50 = arith.constant 9.99999974E-6 : f32
    %97 = vector.broadcast %cst_50 : f32 to vector<8x1xf32>
    %98 = arith.addf %94, %97 : vector<8x1xf32>
    %99 = math.rsqrt %98 : vector<8x1xf32>
    %100 = vector.broadcast %99 : vector<8x1xf32> to vector<8x32xf32>
    %101 = arith.mulf %96, %100 : vector<8x32xf32>
    %c0_51 = arith.constant 0 : index
    %c0_52 = arith.constant 0 : index
    %102 = vector.load %arg7[%c0_51, %c0_52] : memref<32x32xf32, #tpu.memory_space<vmem>>, vector<32x32xf32>
    %cst_53 = arith.constant dense<0.000000e+00> : vector<8x32xf32>
    %103 = tpu.matmul %101, %102, %cst_53 {dimension_numbers = #tpu.dot_dimension_numbers<[1], [0], [0], [1], [0, 0, 1, 1], [], []>} : vector<8x32xf32>, vector<32x32xf32>, vector<8x32xf32> -> vector<8x32xf32>
    %c0_54 = arith.constant 0 : index
    %c0_55 = arith.constant 0 : index
    %104 = vector.load %arg8[%c0_54, %c0_55] : memref<32x32xf32, #tpu.memory_space<vmem>>, vector<32x32xf32>
    %cst_56 = arith.constant dense<0.000000e+00> : vector<8x32xf32>
    %105 = tpu.matmul %3, %104, %cst_56 {dimension_numbers = #tpu.dot_dimension_numbers<[1], [0], [0], [1], [0, 0, 1, 1], [], []>} : vector<8x32xf32>, vector<32x32xf32>, vector<8x32xf32> -> vector<8x32xf32>
    %c0_57 = arith.constant 0 : index
    %c0_58 = arith.constant 0 : index
    %106 = vector.load %arg9[%c0_57, %c0_58] : memref<32x32xf32, #tpu.memory_space<vmem>>, vector<32x32xf32>
    %cst_59 = arith.constant dense<0.000000e+00> : vector<8x32xf32>
    %107 = tpu.matmul %3, %106, %cst_59 {dimension_numbers = #tpu.dot_dimension_numbers<[1], [0], [0], [1], [0, 0, 1, 1], [], []>} : vector<8x32xf32>, vector<32x32xf32>, vector<8x32xf32> -> vector<8x32xf32>
    %108 = vector.extract_strided_slice %103 {offsets = [0, 0], sizes = [8, 8], strides = [1, 1]} : vector<8x32xf32> to vector<8x8xf32>
    %109 = vector.extract_strided_slice %105 {offsets = [0, 0], sizes = [8, 8], strides = [1, 1]} : vector<8x32xf32> to vector<8x8xf32>
    %cst_60 = arith.constant dense<0.000000e+00> : vector<8x8xf32>
    %110 = tpu.matmul %108, %109, %cst_60 {dimension_numbers = #tpu.dot_dimension_numbers<[1], [1], [0], [0], [0, 0, 1, 0], [], []>} : vector<8x8xf32>, vector<8x8xf32>, vector<8x8xf32> -> vector<8x8xf32>
    %cst_61 = arith.constant 0.353553385 : f32
    %111 = vector.broadcast %cst_61 : f32 to vector<8x8xf32>
    %112 = arith.mulf %110, %111 : vector<8x8xf32>
    %cst_62 = arith.constant dense<0xFF800000> : vector<8xf32>
    %113 = vector.multi_reduction <maximumf>, %112, %cst_62 [1] : vector<8x8xf32> to vector<8xf32>
    %114 = vector.shape_cast %113 : vector<8xf32> to vector<8x1xf32>
    %115 = vector.broadcast %114 : vector<8x1xf32> to vector<8x8xf32>
    %116 = arith.subf %112, %115 : vector<8x8xf32>
    %117 = math.exp %116 : vector<8x8xf32>
    %cst_63 = arith.constant dense<0.000000e+00> : vector<8xf32>
    %118 = vector.multi_reduction <add>, %117, %cst_63 [1] : vector<8x8xf32> to vector<8xf32>
    %119 = vector.shape_cast %118 : vector<8xf32> to vector<8x1xf32>
    %120 = vector.broadcast %119 : vector<8x1xf32> to vector<8x8xf32>
    %121 = arith.divf %117, %120 : vector<8x8xf32>
    %c0_64 = arith.constant 0 : index
    %c0_65 = arith.constant 0 : index
    %c0_66 = arith.constant 0 : index
    %c0_67 = arith.constant 0 : index
    %122 = vector.load %arg17[%c0_64, %c0_65, %c0_66, %c0_67] : memref<1x4x8x8xf32, #tpu.memory_space<vmem>>, vector<1x1x8x8xf32>
    %123 = vector.shape_cast %122 : vector<1x1x8x8xf32> to vector<8x8xf32>
    %124 = vector.shape_cast %121 : vector<8x8xf32> to vector<1x1x8x8xf32>
    tpu.vector_store %arg17[%c0_64, %c0_65, %c0_66, %c0_67], %124 {strides = array<i32>} : memref<1x4x8x8xf32, #tpu.memory_space<vmem>>, vector<1x1x8x8xf32>,
    %125 = vector.extract_strided_slice %103 {offsets = [0, 8], sizes = [8, 8], strides = [1, 1]} : vector<8x32xf32> to vector<8x8xf32>
    %126 = vector.extract_strided_slice %105 {offsets = [0, 8], sizes = [8, 8], strides = [1, 1]} : vector<8x32xf32> to vector<8x8xf32>
    %cst_68 = arith.constant dense<0.000000e+00> : vector<8x8xf32>
    %127 = tpu.matmul %125, %126, %cst_68 {dimension_numbers = #tpu.dot_dimension_numbers<[1], [1], [0], [0], [0, 0, 1, 0], [], []>} : vector<8x8xf32>, vector<8x8xf32>, vector<8x8xf32> -> vector<8x8xf32>
    %cst_69 = arith.constant 0.353553385 : f32
    %128 = vector.broadcast %cst_69 : f32 to vector<8x8xf32>
    %129 = arith.mulf %127, %128 : vector<8x8xf32>
    %cst_70 = arith.constant dense<0xFF800000> : vector<8xf32>
    %130 = vector.multi_reduction <maximumf>, %129, %cst_70 [1] : vector<8x8xf32> to vector<8xf32>
    %131 = vector.shape_cast %130 : vector<8xf32> to vector<8x1xf32>
    %132 = vector.broadcast %131 : vector<8x1xf32> to vector<8x8xf32>
    %133 = arith.subf %129, %132 : vector<8x8xf32>
    %134 = math.exp %133 : vector<8x8xf32>
    %cst_71 = arith.constant dense<0.000000e+00> : vector<8xf32>
    %135 = vector.multi_reduction <add>, %134, %cst_71 [1] : vector<8x8xf32> to vector<8xf32>
    %136 = vector.shape_cast %135 : vector<8xf32> to vector<8x1xf32>
    %137 = vector.broadcast %136 : vector<8x1xf32> to vector<8x8xf32>
    %138 = arith.divf %134, %137 : vector<8x8xf32>
    %c0_72 = arith.constant 0 : index
    %c1_73 = arith.constant 1 : index
    %c0_74 = arith.constant 0 : index
    %c0_75 = arith.constant 0 : index
    %139 = vector.load %arg17[%c0_72, %c1_73, %c0_74, %c0_75] : memref<1x4x8x8xf32, #tpu.memory_space<vmem>>, vector<1x1x8x8xf32>
    %140 = vector.shape_cast %139 : vector<1x1x8x8xf32> to vector<8x8xf32>
    %141 = vector.shape_cast %138 : vector<8x8xf32> to vector<1x1x8x8xf32>
    tpu.vector_store %arg17[%c0_72, %c1_73, %c0_74, %c0_75], %141 {strides = array<i32>} : memref<1x4x8x8xf32, #tpu.memory_space<vmem>>, vector<1x1x8x8xf32>,
    %142 = vector.extract_strided_slice %103 {offsets = [0, 16], sizes = [8, 8], strides = [1, 1]} : vector<8x32xf32> to vector<8x8xf32>
    %143 = vector.extract_strided_slice %105 {offsets = [0, 16], sizes = [8, 8], strides = [1, 1]} : vector<8x32xf32> to vector<8x8xf32>
    %cst_76 = arith.constant dense<0.000000e+00> : vector<8x8xf32>
    %144 = tpu.matmul %142, %143, %cst_76 {dimension_numbers = #tpu.dot_dimension_numbers<[1], [1], [0], [0], [0, 0, 1, 0], [], []>} : vector<8x8xf32>, vector<8x8xf32>, vector<8x8xf32> -> vector<8x8xf32>
    %cst_77 = arith.constant 0.353553385 : f32
    %145 = vector.broadcast %cst_77 : f32 to vector<8x8xf32>
    %146 = arith.mulf %144, %145 : vector<8x8xf32>
    %cst_78 = arith.constant dense<0xFF800000> : vector<8xf32>
    %147 = vector.multi_reduction <maximumf>, %146, %cst_78 [1] : vector<8x8xf32> to vector<8xf32>
    %148 = vector.shape_cast %147 : vector<8xf32> to vector<8x1xf32>
    %149 = vector.broadcast %148 : vector<8x1xf32> to vector<8x8xf32>
    %150 = arith.subf %146, %149 : vector<8x8xf32>
    %151 = math.exp %150 : vector<8x8xf32>
    %cst_79 = arith.constant dense<0.000000e+00> : vector<8xf32>
    %152 = vector.multi_reduction <add>, %151, %cst_79 [1] : vector<8x8xf32> to vector<8xf32>
    %153 = vector.shape_cast %152 : vector<8xf32> to vector<8x1xf32>
    %154 = vector.broadcast %153 : vector<8x1xf32> to vector<8x8xf32>
    %155 = arith.divf %151, %154 : vector<8x8xf32>
    %c0_80 = arith.constant 0 : index
    %c2_81 = arith.constant 2 : index
    %c0_82 = arith.constant 0 : index
    %c0_83 = arith.constant 0 : index
    %156 = vector.load %arg17[%c0_80, %c2_81, %c0_82, %c0_83] : memref<1x4x8x8xf32, #tpu.memory_space<vmem>>, vector<1x1x8x8xf32>
    %157 = vector.shape_cast %156 : vector<1x1x8x8xf32> to vector<8x8xf32>
    %158 = vector.shape_cast %155 : vector<8x8xf32> to vector<1x1x8x8xf32>
    tpu.vector_store %arg17[%c0_80, %c2_81, %c0_82, %c0_83], %158 {strides = array<i32>} : memref<1x4x8x8xf32, #tpu.memory_space<vmem>>, vector<1x1x8x8xf32>,
    %159 = vector.extract_strided_slice %103 {offsets = [0, 24], sizes = [8, 8], strides = [1, 1]} : vector<8x32xf32> to vector<8x8xf32>
    %160 = vector.extract_strided_slice %105 {offsets = [0, 24], sizes = [8, 8], strides = [1, 1]} : vector<8x32xf32> to vector<8x8xf32>
    %cst_84 = arith.constant dense<0.000000e+00> : vector<8x8xf32>
    %161 = tpu.matmul %159, %160, %cst_84 {dimension_numbers = #tpu.dot_dimension_numbers<[1], [1], [0], [0], [0, 0, 1, 0], [], []>} : vector<8x8xf32>, vector<8x8xf32>, vector<8x8xf32> -> vector<8x8xf32>
    %cst_85 = arith.constant 0.353553385 : f32
    %162 = vector.broadcast %cst_85 : f32 to vector<8x8xf32>
    %163 = arith.mulf %161, %162 : vector<8x8xf32>
    %cst_86 = arith.constant dense<0xFF800000> : vector<8xf32>
    %164 = vector.multi_reduction <maximumf>, %163, %cst_86 [1] : vector<8x8xf32> to vector<8xf32>
    %165 = vector.shape_cast %164 : vector<8xf32> to vector<8x1xf32>
    %166 = vector.broadcast %165 : vector<8x1xf32> to vector<8x8xf32>
    %167 = arith.subf %163, %166 : vector<8x8xf32>
    %168 = math.exp %167 : vector<8x8xf32>
    %cst_87 = arith.constant dense<0.000000e+00> : vector<8xf32>
    %169 = vector.multi_reduction <add>, %168, %cst_87 [1] : vector<8x8xf32> to vector<8xf32>
    %170 = vector.shape_cast %169 : vector<8xf32> to vector<8x1xf32>
    %171 = vector.broadcast %170 : vector<8x1xf32> to vector<8x8xf32>
    %172 = arith.divf %168, %171 : vector<8x8xf32>
    %c0_88 = arith.constant 0 : index
    %c3_89 = arith.constant 3 : index
    %c0_90 = arith.constant 0 : index
    %c0_91 = arith.constant 0 : index
    %173 = vector.load %arg17[%c0_88, %c3_89, %c0_90, %c0_91] : memref<1x4x8x8xf32, #tpu.memory_space<vmem>>, vector<1x1x8x8xf32>
    %174 = vector.shape_cast %173 : vector<1x1x8x8xf32> to vector<8x8xf32>
    %175 = vector.shape_cast %172 : vector<8x8xf32> to vector<1x1x8x8xf32>
    tpu.vector_store %arg17[%c0_88, %c3_89, %c0_90, %c0_91], %175 {strides = array<i32>} : memref<1x4x8x8xf32, #tpu.memory_space<vmem>>, vector<1x1x8x8xf32>,
    %cst_92 = arith.constant dense<0.000000e+00> : vector<32xf32>
    %176 = vector.multi_reduction <add>, %107, %cst_92 [0] : vector<8x32xf32> to vector<32xf32>
    %177 = vector.shape_cast %176 : vector<32xf32> to vector<1x32xf32>
    %c0_93 = arith.constant 0 : index
    %c0_94 = arith.constant 0 : index
    %178 = vector.load %arg10[%c0_93, %c0_94] : memref<32x32xf32, #tpu.memory_space<vmem>>, vector<32x32xf32>
    %cst_95 = arith.constant dense<0.000000e+00> : vector<1x32xf32>
    %179 = tpu.matmul %177, %178, %cst_95 {dimension_numbers = #tpu.dot_dimension_numbers<[1], [0], [0], [1], [0, 0, 1, 1], [], []>} : vector<1x32xf32>, vector<32x32xf32>, vector<1x32xf32> -> vector<1x32xf32>
    %180 = vector.broadcast %179 : vector<1x32xf32> to vector<8x32xf32>
    %181 = arith.addf %101, %180 : vector<8x32xf32>
    %cst_96 = arith.constant dense<0.000000e+00> : vector<8xf32>
    %182 = vector.multi_reduction <add>, %181, %cst_96 [1] : vector<8x32xf32> to vector<8xf32>
    %183 = vector.shape_cast %182 : vector<8xf32> to vector<8x1xf32>
    %cst_97 = arith.constant 3.200000e+01 : f32
    %184 = vector.broadcast %cst_97 : f32 to vector<8x1xf32>
    %185 = arith.divf %183, %184 : vector<8x1xf32>
    %186 = vector.broadcast %185 : vector<8x1xf32> to vector<8x32xf32>
    %187 = arith.subf %181, %186 : vector<8x32xf32>
    %188 = arith.mulf %187, %187 : vector<8x32xf32>
    %cst_98 = arith.constant dense<0.000000e+00> : vector<8xf32>
    %189 = vector.multi_reduction <add>, %188, %cst_98 [1] : vector<8x32xf32> to vector<8xf32>
    %190 = vector.shape_cast %189 : vector<8xf32> to vector<8x1xf32>
    %cst_99 = arith.constant 3.200000e+01 : f32
    %191 = vector.broadcast %cst_99 : f32 to vector<8x1xf32>
    %192 = arith.divf %190, %191 : vector<8x1xf32>
    %193 = vector.broadcast %185 : vector<8x1xf32> to vector<8x32xf32>
    %194 = arith.subf %181, %193 : vector<8x32xf32>
    %cst_100 = arith.constant 9.99999974E-6 : f32
    %195 = vector.broadcast %cst_100 : f32 to vector<8x1xf32>
    %196 = arith.addf %192, %195 : vector<8x1xf32>
    %197 = math.rsqrt %196 : vector<8x1xf32>
    %198 = vector.broadcast %197 : vector<8x1xf32> to vector<8x32xf32>
    %199 = arith.mulf %194, %198 : vector<8x32xf32>
    %c0_101 = arith.constant 0 : index
    %c0_102 = arith.constant 0 : index
    %200 = vector.load %arg11[%c0_101, %c0_102] : memref<32x64xf32, #tpu.memory_space<vmem>>, vector<32x64xf32>
    %cst_103 = arith.constant dense<0.000000e+00> : vector<8x64xf32>
    %201 = tpu.matmul %199, %200, %cst_103 {dimension_numbers = #tpu.dot_dimension_numbers<[1], [0], [0], [1], [0, 0, 1, 1], [], []>} : vector<8x32xf32>, vector<32x64xf32>, vector<8x64xf32> -> vector<8x64xf32>
    %c0_104 = arith.constant 0 : index
    %c0_105 = arith.constant 0 : index
    %202 = vector.load %arg12[%c0_104, %c0_105] : memref<1x64xf32, #tpu.memory_space<vmem>>, vector<1x64xf32>
    %203 = vector.broadcast %202 : vector<1x64xf32> to vector<8x64xf32>
    %204 = arith.addf %201, %203 : vector<8x64xf32>
    %cst_106 = arith.constant 0.000000e+00 : f32
    %205 = vector.broadcast %cst_106 : f32 to vector<8x64xf32>
    %206 = arith.maximumf %204, %205 : vector<8x64xf32>
    %c0_107 = arith.constant 0 : index
    %c0_108 = arith.constant 0 : index
    %207 = vector.load %arg13[%c0_107, %c0_108] : memref<64x32xf32, #tpu.memory_space<vmem>>, vector<64x32xf32>
    %cst_109 = arith.constant dense<0.000000e+00> : vector<8x32xf32>
    %208 = tpu.matmul %206, %207, %cst_109 {dimension_numbers = #tpu.dot_dimension_numbers<[1], [0], [0], [1], [0, 0, 1, 1], [], []>} : vector<8x64xf32>, vector<64x32xf32>, vector<8x32xf32> -> vector<8x32xf32>
    %c0_110 = arith.constant 0 : index
    %c0_111 = arith.constant 0 : index
    %209 = vector.load %arg14[%c0_110, %c0_111] : memref<1x32xf32, #tpu.memory_space<vmem>>, vector<1x32xf32>
    %210 = vector.broadcast %209 : vector<1x32xf32> to vector<8x32xf32>
    %211 = arith.addf %208, %210 : vector<8x32xf32>
    %212 = arith.addf %199, %211 : vector<8x32xf32>
    %cst_112 = arith.constant dense<0.000000e+00> : vector<8xf32>
    %213 = vector.multi_reduction <add>, %212, %cst_112 [1] : vector<8x32xf32> to vector<8xf32>
    %214 = vector.shape_cast %213 : vector<8xf32> to vector<8x1xf32>
    %cst_113 = arith.constant 3.200000e+01 : f32
    %215 = vector.broadcast %cst_113 : f32 to vector<8x1xf32>
    %216 = arith.divf %214, %215 : vector<8x1xf32>
    %217 = vector.broadcast %216 : vector<8x1xf32> to vector<8x32xf32>
    %218 = arith.subf %212, %217 : vector<8x32xf32>
    %219 = arith.mulf %218, %218 : vector<8x32xf32>
    %cst_114 = arith.constant dense<0.000000e+00> : vector<8xf32>
    %220 = vector.multi_reduction <add>, %219, %cst_114 [1] : vector<8x32xf32> to vector<8xf32>
    %221 = vector.shape_cast %220 : vector<8xf32> to vector<8x1xf32>
    %cst_115 = arith.constant 3.200000e+01 : f32
    %222 = vector.broadcast %cst_115 : f32 to vector<8x1xf32>
    %223 = arith.divf %221, %222 : vector<8x1xf32>
    %224 = vector.broadcast %216 : vector<8x1xf32> to vector<8x32xf32>
    %225 = arith.subf %212, %224 : vector<8x32xf32>
    %cst_116 = arith.constant 9.99999974E-6 : f32
    %226 = vector.broadcast %cst_116 : f32 to vector<8x1xf32>
    %227 = arith.addf %223, %226 : vector<8x1xf32>
    %228 = math.rsqrt %227 : vector<8x1xf32>
    %229 = vector.broadcast %228 : vector<8x1xf32> to vector<8x32xf32>
    %230 = arith.mulf %225, %229 : vector<8x32xf32>
    %c0_117 = arith.constant 0 : index
    %c0_118 = arith.constant 0 : index
    %c0_119 = arith.constant 0 : index
    %231 = vector.load %arg15[%c0_117, %c0_118, %c0_119] : memref<1x8x32xf32, #tpu.memory_space<vmem>>, vector<1x8x32xf32>
    %232 = vector.shape_cast %231 : vector<1x8x32xf32> to vector<8x32xf32>
    %233 = vector.shape_cast %230 : vector<8x32xf32> to vector<1x8x32xf32>
    tpu.vector_store %arg15[%c0_117, %c0_118, %c0_119], %233 {strides = array<i32>} : memref<1x8x32xf32, #tpu.memory_space<vmem>>, vector<1x8x32xf32>,
    return
  }
  func.func @transform_0(%arg0: i32) -> (i32, i32, i32) {
    %c0_i32 = arith.constant 0 : i32
    %c0_i32_0 = arith.constant 0 : i32
    %c0_i32_1 = arith.constant 0 : i32
    return %arg0, %c0_i32, %c0_i32_0 : i32, i32, i32
  }
  func.func @transform_1(%arg0: i32) -> (i32, i32, i32) {
    %c0_i32 = arith.constant 0 : i32
    %c0_i32_0 = arith.constant 0 : i32
    %c0_i32_1 = arith.constant 0 : i32
    return %arg0, %c0_i32, %c0_i32_0 : i32, i32, i32
  }
  func.func @transform_2(%arg0: i32) -> (i32, i32) {
    %c0_i32 = arith.constant 0 : i32
    %c0_i32_0 = arith.constant 0 : i32
    %c0_i32_1 = arith.constant 0 : i32
    return %c0_i32, %c0_i32_0 : i32, i32
  }
  func.func @transform_3(%arg0: i32) -> (i32, i32) {
    %c0_i32 = arith.constant 0 : i32
    %c0_i32_0 = arith.constant 0 : i32
    %c0_i32_1 = arith.constant 0 : i32
    return %c0_i32, %c0_i32_0 : i32, i32
  }
  func.func @transform_4(%arg0: i32) -> (i32, i32) {
    %c0_i32 = arith.constant 0 : i32
    %c0_i32_0 = arith.constant 0 : i32
    %c0_i32_1 = arith.constant 0 : i32
    return %c0_i32, %c0_i32_0 : i32, i32
  }
  func.func @transform_5(%arg0: i32) -> (i32, i32) {
    %c0_i32 = arith.constant 0 : i32
    %c0_i32_0 = arith.constant 0 : i32
    %c0_i32_1 = arith.constant 0 : i32
    return %c0_i32, %c0_i32_0 : i32, i32
  }
  func.func @transform_6(%arg0: i32) -> (i32, i32) {
    %c0_i32 = arith.constant 0 : i32
    %c0_i32_0 = arith.constant 0 : i32
    %c0_i32_1 = arith.constant 0 : i32
    return %c0_i32, %c0_i32_0 : i32, i32
  }
  func.func @transform_7(%arg0: i32) -> (i32, i32) {
    %c0_i32 = arith.constant 0 : i32
    %c0_i32_0 = arith.constant 0 : i32
    %c0_i32_1 = arith.constant 0 : i32
    return %c0_i32, %c0_i32_0 : i32, i32
  }
  func.func @transform_8(%arg0: i32) -> (i32, i32) {
    %c0_i32 = arith.constant 0 : i32
    %c0_i32_0 = arith.constant 0 : i32
    %c0_i32_1 = arith.constant 0 : i32
    return %c0_i32, %c0_i32_0 : i32, i32
  }
  func.func @transform_9(%arg0: i32) -> (i32, i32) {
    %c0_i32 = arith.constant 0 : i32
    %c0_i32_0 = arith.constant 0 : i32
    %c0_i32_1 = arith.constant 0 : i32
    return %c0_i32, %c0_i32_0 : i32, i32
  }
  func.func @transform_10(%arg0: i32) -> (i32, i32) {
    %c0_i32 = arith.constant 0 : i32
    %c0_i32_0 = arith.constant 0 : i32
    %c0_i32_1 = arith.constant 0 : i32
    return %c0_i32, %c0_i32_0 : i32, i32
  }
  func.func @transform_11(%arg0: i32) -> (i32, i32) {
    %c0_i32 = arith.constant 0 : i32
    %c0_i32_0 = arith.constant 0 : i32
    %c0_i32_1 = arith.constant 0 : i32
    return %c0_i32, %c0_i32_0 : i32, i32
  }
  func.func @transform_12(%arg0: i32) -> (i32, i32) {
    %c0_i32 = arith.constant 0 : i32
    %c0_i32_0 = arith.constant 0 : i32
    %c0_i32_1 = arith.constant 0 : i32
    return %c0_i32, %c0_i32_0 : i32, i32
  }
  func.func @transform_13(%arg0: i32) -> (i32, i32) {
    %c0_i32 = arith.constant 0 : i32
    %c0_i32_0 = arith.constant 0 : i32
    %c0_i32_1 = arith.constant 0 : i32
    return %c0_i32, %c0_i32_0 : i32, i32
  }
  func.func @transform_14(%arg0: i32) -> (i32, i32, i32) {
    %c0_i32 = arith.constant 0 : i32
    %c0_i32_0 = arith.constant 0 : i32
    %c0_i32_1 = arith.constant 0 : i32
    return %arg0, %c0_i32, %c0_i32_0 : i32, i32, i32
  }
  func.func @transform_15(%arg0: i32) -> (i32, i32, i32, i32) {
    %c0_i32 = arith.constant 0 : i32
    %c0_i32_0 = arith.constant 0 : i32
    %c0_i32_1 = arith.constant 0 : i32
    %c0_i32_2 = arith.constant 0 : i32
    return %arg0, %c0_i32, %c0_i32_0, %c0_i32_1 : i32, i32, i32, i32
  }
  func.func @transform_16(%arg0: i32) -> (i32, i32, i32, i32) {
    %c0_i32 = arith.constant 0 : i32
    %c0_i32_0 = arith.constant 0 : i32
    %c0_i32_1 = arith.constant 0 : i32
    %c0_i32_2 = arith.constant 0 : i32
    return %arg0, %c0_i32, %c0_i32_0, %c0_i32_1 : i32, i32, i32, i32
  }
}

</mosaic_0001>

<bundles_post_ra>
// kernel: decoder_layer.1
= control target key start
LH: loop header
LB: loop body
LE: loop exit
PB: predicated region body
PF: predicated region fallthrough
CT: control target
= control target key end

     0   :  { %s3079_s0 = inlined_call_operand.hbm [shape: f32[2,8,32], index: 0, kind: input, shape index: {}]   ;;  %s3080_s1 = inlined_call_operand.hbm [shape: f32[2,8,32], index: 1, kind: input, shape index: {}]   ;;  %s3081_s2 = inlined_call_operand.vmem [shape: f32[32,32], index: 2, kind: input, shape index: {}]   ;;  %s3082_s3 = inlined_call_operand.vmem [shape: f32[32,32], index: 3, kind: input, shape index: {}]   ;;  %s3083_s4 = inlined_call_operand.vmem [shape: f32[32,32], index: 4, kind: input, shape index: {}]   ;;  %s3084_s5 = inlined_call_operand.hbm [shape: f32[32,32], index: 5, kind: input, shape index: {}]   ;;  %s3085_s6 = inlined_call_operand.hbm [shape: f32[32,32], index: 6, kind: input, shape index: {}]   ;;  %s3086_s7 = inlined_call_operand.hbm [shape: f32[32,32], index: 7, kind: input, shape index: {}]   ;;  %s3087_s8 = inlined_call_operand.hbm [shape: f32[32,32], index: 8, kind: input, shape index: {}]   ;;  %s3088_s9 = inlined_call_operand.hbm [shape: f32[32,32], index: 9, kind: input, shape index: {}]   ;;  %s3089_s10 = inlined_call_operand.hbm [shape: f32[32,64], index: 10, kind: input, shape index: {}]   ;;  %s3090_s11 = inlined_call_operand.vmem [shape: f32[1,64], index: 11, kind: input, shape index: {}]   ;;  %s3091_s12 = inlined_call_operand.vmem [shape: f32[64,32], index: 12, kind: input, shape index: {}]   ;;  %s3092_s13 = inlined_call_operand.hbm [shape: f32[1,32], index: 13, kind: input, shape index: {}]   ;;  %s3093_s14 = inlined_call_operand.hbm [shape: f32[2,8,32], index: 14, kind: output, shape index: {0}]   ;;  %s3094_s15 = inlined_call_operand.hbm [shape: f32[2,4,8,8], index: 15, kind: output, shape index: {1}]   ;;  %s3095_s16 = inlined_call_operand.hbm [shape: f32[2,4,8,8], index: 16, kind: output, shape index: {2}]  }
   0x1   :  { %3107 = sst [smem:[#allocation34_spill]] %s3079_s0 }
   0x2   :  { %3108 = sst [smem:[#allocation35_spill]] %s3084_s5 }
   0x3   :  { %3109 = sst [smem:[#allocation36_spill]] %s3085_s6 }
   0x4   :  { %3110 = sst [smem:[#allocation37_spill]] %s3086_s7 }
   0x5   :  { %3111 = sst [smem:[#allocation38_spill]] %s3087_s8 }
   0x6   :  { %3112 = sst [smem:[#allocation39_spill]] %s3088_s9 }
   0x7   :  { %3113 = sst [smem:[#allocation40_spill]] %s3089_s10 }
   0x8   :  { %3114 = sst [smem:[#allocation41_spill]] %s3092_s13 }
   0x9   :  { %3115 = sst [smem:[#allocation42_spill]] %s3093_s14 }
   0xa   :  { %3116 = sst [smem:[#allocation43_spill]] %s3094_s15 }
   0xb   :  { %3117 = sst [smem:[#allocation44_spill]] %s3095_s16 }
   0xc   :  { %22 = vsyncpa [#allocation3], 0 }
   0xd   :  { %24 = vsyncpa [#allocation3 + $0x1], 0 }
   0xe   :  { %25 = vsyncpa [#allocation6], 0 }
   0xf   :  { %27 = vsyncpa [#allocation6 + $0x1], 0 }
  0x10   :  { %28 = vsyncpa [#allocation9], 0 }
  0x11   :  { %29 = vsyncpa [#allocation12], 0 }
  0x12   :  { %30 = vsyncpa [#allocation15], 0 }
  0x13   :  { %31 = vsyncpa [#allocation4], 0 }
  0x14   :  { %33 = vsyncpa [#allocation4 + $0x1], 0 }
  0x15   :  { %34 = vsyncpa [#allocation19], 0 }
  0x16   :  { %36 = vsyncpa [#allocation19 + $0x1], 0  ;;  %s2568_s21 = smov 0   ;;  %s2570_s22 = smov 0  }
  0x17   :  { %s2572_s23 = smov 0   ;;  %s2574_s24 = smov 0  }
  0x18 LB: > { %3118 = sst [smem:[#allocation29_spill]] %s2462_s23  ;;  %s2592_s28 = sadd.s32 4294967295, %s2466_s24   ;;  %s2466_s24 = sphi %s2574_s24, %s3145_s24   ;;  %s2462_s23 = sphi %s2572_s23, %s3147_s23   ;;  %s2458_s22 = sphi %s2570_s22, %s3149_s22   ;;  %s2454_s21 = sphi %s2568_s21, %s3148_s21  }
  0x19   : > { %3119 = sst [smem:[#allocation30_spill]] %s2466_s24  ;;  %p1798_p0 = scmp.ge.s32.totalorder %s2466_s24, 1 }
  0x1a   : > { %s3120_s5 = sld [smem:[#allocation35_spill]]  ;;  %p63_p1 = scmp.eq.s32.totalorder %s2592_s28, 0 }
  0x1b   : > { %p429_p2 = scmp.lt.s32.totalorder %s2466_s24, 3  ;;  %s2468_s30 = smov [#allocation7]  }
  0x1c   : > { %s451_s0 = sshll.u32 %s2468_s30, 4  ;;  %s3122_s6 = sld [smem:[#allocation36_spill]]  ;;  %s452_s0 = int_to_ptr.vmem [resolvable:$true] %s451_s0 }
  0x1d   : > { %p2597_p3 = pnand %p1798_p0, %p429_p2  ;;  %s3124_s8 = sld [smem:[#allocation38_spill]] }
  0x1e   : > { %s2470_s16 = smov 128   ;;  %s2471_s15 = smov 8  }
  0x1f   : > { %p1906_p4 = pneg %p2597_p3  ;;  %s3125_s10 = sld [smem:[#allocation40_spill]] }
  0x20   : > { %s449_s27 = sshll.u32 %s3120_s5, 4  ;;  %s2469_s5 = smov [#allocation8]   ;;  %s450_s27 = int_to_ptr.hbm [resolvable:$true] %s449_s27 }
  0x21   : > { %p2609_p6 = pnand %p1906_p4, %p63_p1  ;;  %s465_s14 = sshll.u32 %s2469_s5, 4  ;;  %s466_s14 = int_to_ptr.vmem [resolvable:$true] %s465_s14 }
  0x22   : > { %s463_s19 = sshll.u32 %s3122_s6, 4  ;;  %s2472_s5 = smov [#allocation11]   ;;  %s464_s19 = int_to_ptr.hbm [resolvable:$true] %s463_s19 }
  0x23   : > { %s491_s30 = sshll.u32 %s3124_s8, 4  ;;  %s493_s26 = sshll.u32 %s2472_s5, 4  ;;  %s492_s30 = int_to_ptr.hbm [resolvable:$true] %s491_s30  ;;  %s494_s26 = int_to_ptr.vmem [resolvable:$true] %s493_s26 }
  0x24   : > { %1909 = dma.hbm_to_vmem [thread:$0]  (!%p2609_p6), %s450_s27, 512, %s452_s0, [#allocation6], %s2470_s16, %s2470_s16, %s2471_s15  }
  0x25   : > { %1912 = dma.hbm_to_vmem [thread:$0]  (!%p2609_p6), %s464_s19, 512, %s466_s14, [#allocation9], %s2470_s16, %s2470_s16, %s2471_s15  }
  0x26   : > { %s519_s25 = sshll.u32 %s3125_s10, 4  ;;  %s2473_s27 = smov [#allocation14]   ;;  %s520_s25 = int_to_ptr.hbm [resolvable:$true] %s519_s25 }
  0x27   : > { %1918 = dma.hbm_to_vmem [thread:$0]  (!%p2609_p6), %s492_s30, 512, %s494_s26, [#allocation12], %s2470_s16, %s2470_s16, %s2471_s15  }
  0x28   : > { %s521_s0 = sshll.u32 %s2473_s27, 4  ;;  %s3126_s7 = sld [smem:[#allocation37_spill]]  ;;  %s522_s0 = int_to_ptr.vmem [resolvable:$true] %s521_s0 }
  0x29   : > { %1924 = dma.hbm_to_vmem [thread:$0]  (!%p2609_p6), %s520_s25, 512, %s522_s0, [#allocation15], %s2470_s16, %s2470_s16, %s2471_s15  }
  0x2a   : > { %s3127_s9 = sld [smem:[#allocation39_spill]]  ;;  %s2474_s30 = smov [#allocation10]  }
  0x2b   : > { %s479_s5 = sshll.u32 %s2474_s30, 4  ;;  %s2475_s6 = smov [#allocation13]   ;;  %s480_s5 = int_to_ptr.vmem [resolvable:$true] %s479_s5 }
  0x2c   : > { %s507_s8 = sshll.u32 %s2475_s6, 4  ;;  %s3128_s13 = sld [smem:[#allocation41_spill]]  ;;  %s508_s8 = int_to_ptr.vmem [resolvable:$true] %s507_s8 }
  0x2d   : > { %s2476_s0 = smov [#allocation16]   ;;  %s3100_s19 = sadd.s32 4294967294, %s2466_s24  }
  0x2e   : > { %s477_s14 = sshll.u32 %s3126_s7, 4  ;;  %s2662_s17 = sadd.s32 1, %s2466_s24   ;;  %s478_s14 = int_to_ptr.hbm [resolvable:$true] %s477_s14 }
  0x2f   : > { %1915 = dma.hbm_to_vmem [thread:$0]  (!%p2609_p6), %s478_s14, 512, %s480_s5, [#allocation9], %s2470_s16, %s2470_s16, %s2471_s15  }
  0x30   : > { %s505_s18 = sshll.u32 %s3127_s9, 4  ;;  %s542_s14 = sshll.u32 %s2476_s0, 4  ;;  %s506_s18 = int_to_ptr.hbm [resolvable:$true] %s505_s18  ;;  %s543_s14 = int_to_ptr.vmem [resolvable:$true] %s542_s14 }
  0x31   : > { %1921 = dma.hbm_to_vmem [thread:$0]  (!%p2609_p6), %s506_s18, 512, %s508_s8, [#allocation12], %s2470_s16, %s2470_s16, %s2471_s15  }
  0x32   : > { %s540_s27 = sshll.u32 %s3128_s13, 4  ;;  %3129 = sst [smem:[#allocation31_spill]] %s2662_s17  ;;  %s541_s27 = int_to_ptr.hbm [resolvable:$true] %s540_s27 }
  0x33   : > { %1927 = dma.hbm_to_vmem [thread:$0]  (!%p2609_p6), %s541_s27, 16, %s543_s14, [#allocation15]  }
  0x34   : > { %s49_s30 = sadd.s32 1, %s2462_s23  ;;  %s46_s5 = ssub.s32 %s2466_s24, %s2662_s17 }
  0x35   : > { %p56_p7 = scmp.ne.s32.totalorder %s2462_s23, %s2458_s22  ;;  %p47_p8 = scmp.eq.s32.totalorder %s46_s5, 0 }
  0x36   : > { %p57_p9 = scmp.eq.s32.totalorder %s2466_s24, 0  ;;  %p62_p10 = scmp.ne.s32.totalorder %s2458_s22, %s2454_s21 }
  0x37   : > { %p364_p11 = scmp.eq.s32.totalorder %s2592_s28, 1  ;;  %p370_p2 = scmp.eq.s32.totalorder %s3100_s19, 1 }
  0x38   : > { %s2674_s15 = scalar_select %p47_p8, %s2462_s23, %s49_s30  }
  0x39   : > { %p2676_p12 = por %p57_p9, %p56_p7  ;;  %p2682_p13 = por %p63_p1, %p62_p10 }
  0x3a   : > { %3130 = sst [smem:[#allocation32_spill]] %s2674_s15  ;;  %p2686_p0 = por %p364_p11, %p56_p7 }
  0x3b   : > { %p1952_p4 = scmp.lt.s32.totalorder %s2466_s24, 2  ;;  %s553_s6 = sand.u32 1, %s2462_s23  }
  0x3c   : > { %p2694_p6 = por %p370_p2, %p62_p10  ;;  %s1807_s25 = sshll.u32 %s553_s6, 3 }
  0x3d   : > { %s1808_s26 = sshll.u32 %s2466_s24, 3  ;;  %s3136_s14 = sld [smem:[#allocation34_spill]] }
  0x3e   : > { %s3134_s8 = scalar_select %p2694_p6, 1, 0 }
  0x3f   : > { %s557_s7 = scalar_lea.vmem [#allocation2], %s1807_s25  ;;  %p2704_p7 = pnand %p1952_p4, %p2676_p12 }
  0x40   : > { %3135 = sst [smem:[#allocation33_spill]] %s3134_s8  ;;  %s565_s9 = sshll.u32 %s557_s7, 4  ;;  %s566_s9 = int_to_ptr.vmem [resolvable:$true] %s565_s9 }
  0x41   : > { %s580_s15 = scalar_lea.hbm %s3080_s1, %s1808_s26  ;;  %s572_s23 = sand.u32 1, %s2466_s24  }
  0x42   : > { %s554_s17 = scalar_lea.sflag [#allocation3], %s553_s6  ;;  %p2264_p9 = pneg %p2704_p7 }
  0x43   : > { %s561_s30 = scalar_lea.hbm %s3136_s14, %s1808_s26 }
  0x44   : > { %s563_s5 = sshll.u32 %s561_s30, 4  ;;  %s2267_s30 = scalar_lea.hbm %s3136_s14, 16  ;;  %s564_s5 = int_to_ptr.hbm [resolvable:$true] %s563_s5 }
  0x45   : > { %s2260_s27 = sshra.s32 %s564_s5, 4  ;;  %s2261_s27 = int_to_ptr.hbm [resolvable:$true] %s2260_s27 }
  0x46   : > { %s2262_s0 = scalar_lea.hbm %s2261_s27, 8  ;;  %p2268_p12 = scmp.lt.s32.totalorder %s2261_s27, %s3136_s14 }
  0x47   : > { %p2263_p8 = scmp.ne.s32.totalorder %s2261_s27, %s2262_s0  ;;  %p2269_p2 = scmp.lt.s32.totalorder %s2267_s30, %s2262_s0 }
  0x49   : > { %p2265_p10 = pnand %p2264_p9, %p2263_p8  ;;  %p2270_p4 = por %p2269_p2, %p2268_p12 }
  0x4b   : > { %p2266_p11 = pneg %p2265_p10 }
  0x4d   : > { %p2271_p5 = pnand %p2270_p4, %p2266_p11 }
  0x4f   : > { %2274 = shalt.err (!%p2271_p5)
}
  0x50   : > { %1931 = dma.hbm_to_vmem [thread:$0]  (!%p2704_p7), %s564_s5, 128, %s566_s9, %s554_s17  }
  0x51   : > { %s582_s6 = sshll.u32 %s580_s15, 4  ;;  %s576_s26 = scalar_lea.vmem [#allocation5], %s1807_s25  ;;  %s583_s6 = int_to_ptr.hbm [resolvable:$true] %s582_s6 }
  0x52   : > { %s584_s24 = sshll.u32 %s576_s26, 4  ;;  %s573_s8 = scalar_lea.sflag [#allocation6], %s572_s23  ;;  %s585_s24 = int_to_ptr.vmem [resolvable:$true] %s584_s24 }
  0x53   : > { %s2290_s7 = sshra.s32 %s583_s6, 4  ;;  %s2297_s30 = scalar_lea.hbm %s3080_s1, 16  ;;  %s2291_s7 = int_to_ptr.hbm [resolvable:$true] %s2290_s7 }
  0x54   : > { %s2292_s16 = scalar_lea.hbm %s2291_s7, 8  ;;  %p2298_p5 = scmp.lt.s32.totalorder %s2291_s7, %s3080_s1 }
  0x55   : > { %p2293_p8 = scmp.ne.s32.totalorder %s2291_s7, %s2292_s16  ;;  %p2299_p11 = scmp.lt.s32.totalorder %s2297_s30, %s2292_s16 }
  0x57   : > { %p2295_p10 = pnand %p2293_p8, %p2264_p9  ;;  %p2300_p2 = por %p2299_p11, %p2298_p5 }
  0x59   : > { %p2296_p12 = pneg %p2295_p10 }
  0x5b   : > { %p2301_p4 = pnand %p2300_p2, %p2296_p12 }
  0x5d   : > { %2304 = shalt.err (!%p2301_p4)
}
  0x5e   : > { %1934 = dma.hbm_to_vmem [thread:$0]  (!%p2704_p7), %s583_s6, 128, %s585_s24, %s573_s8  }
  0x5f   : > { %593 = sbr.rel (%p2597_p3) target bundleno = 1740 (0x6cc), region = 76  ;;  %s2739_s23 = sand.u32 (!%p2597_p3), 1, %s2458_s22  }
  0x60   : > { %s2742_s17 = sshll.u32 (!%p2597_p3), %s2739_s23, 3  ;;  %s596_s15 = scalar_lea.sflag (!%p2597_p3), [#allocation3], %s2739_s23 }
  0x61   : > { %s599_s25 = scalar_lea.vmem (!%p2597_p3), [#allocation2], %s2742_s17 }
  0x64   : > { %2421 = dma.done.wait (%p2682_p13), %s596_s15, 128  }
  0x65   : > { %2423 = vsyncadd (%p2682_p13), %s596_s15, 4294967168  ;;  %s605_s24 = sand.u32 1, %s2592_s28   ;;  %s609_s19 = scalar_lea.vmem [#allocation5], %s2742_s17 }
  0x66   : > { %s606_s29 = scalar_lea.sflag [#allocation6], %s605_s24 }
  0x67   : > { %2425 = dma.done.wait (%p2682_p13), %s606_s29, 128  }
  0x68   : > { %2427 = vsyncadd (%p2682_p13), %s606_s29, 4294967168 }
  0x69   : > { %2429 = dma.done.wait (%p63_p1), [#allocation6], 512  }
  0x6a   : > { %2431 = vsyncadd (%p63_p1), [#allocation6], 4294966784 }
  0x6b   : > { %2433 = dma.done.wait (%p63_p1), [#allocation9], 1024  }
  0x6c   : > { %2435 = vsyncadd (%p63_p1), [#allocation9], 4294966272 }
  0x6d   : > { %2437 = dma.done.wait (%p63_p1), [#allocation12], 1024  }
  0x6e   : > { %2439 = vsyncadd (%p63_p1), [#allocation12], 4294966272 }
  0x6f   : > { %2441 = dma.done.wait (%p63_p1), [#allocation15], 528  }
  0x70   : > { %2443 = vsyncadd (%p63_p1), [#allocation15], 4294966768  ;;  %v766_v0 = vld [vmem:[%s3083_s4 + $0x18] sm:$0xff]  ;;  %v765_v1 = vld [vmem:[%s3083_s4 + $0x10] sm:$0xff]  ;;  %vm715_vm0 = vcmask 261120   ;;  %s2477_s27 = smov 120  }
  0x71   : > { %779 = vmatpush.msra.mxu2 %v766_v0  ;;  %v764_v2 = vld [vmem:[%s3083_s4 + $0x8] sm:$0xff]  ;;  %v763_v3 = vld [vmem:[%s3083_s4] sm:$0xff]  ;;  %v1015_v5 = vld [vmem:[#allocation7 + $0x18] sm:$0xff]  ;;  %vm787_vm1 = vcmask 64512   ;;  %s2478_s0 = smov 104   ;;  %s2479_s30 = smov 112  }
  0x72   : > { %v709_v4 = vld [vmem:[%s599_s25] sm:$0xff]  ;;  %v1014_v6 = vld [vmem:[#allocation7 + $0x10] sm:$0xff]  ;;  %v714_v9 = vld [vmem:[%s3081_s2 + $0x18] sm:$0xff]  ;;  %v2480_v31 = vmov 32.0   ;;  %vm1467_vm14 = vcmask 523264   ;;  %s1866_s25 = sshll.u32 %s2592_s28, 5 }
  0x73   : > { %780 = vmatpush.msra.mxu2 %v765_v1  ;;  %v1013_v7 = vld [vmem:[#allocation7 + $0x8] sm:$0xff]  ;;  %v1012_v8 = vld [vmem:[#allocation7] sm:$0xff]  ;;  %v713_v10 = vld [vmem:[%s3081_s2 + $0x10] sm:$0xff]  ;;  %731 = vmatpush.msra.mxu1 %v714_v9  ;;  %2010 = vrcp.f32 %v2480_v31  ;;  %s3138_s8 = sld [smem:[#allocation43_spill]] }
  0x74   : > { %v712_v11 = vld [vmem:[%s3081_s2 + $0x8] sm:$0xff]  ;;  %v711_v12 = vld [vmem:[%s3081_s2] sm:$0xff]  ;;  %v742_v13 = vld [vmem:[%s3082_s3 + $0x18] sm:$0xff]  ;;  %s3139_s16 = sld [smem:[#allocation44_spill]] }
  0x75   : > { %781 = vmatpush.msra.mxu2 %v764_v2  ;;  %732 = vmatpush.msra.mxu1 %v713_v10  ;;  %v741_v14 = vld [vmem:[%s3082_s3 + $0x10] sm:$0xff]  ;;  %v740_v15 = vld [vmem:[%s3082_s3 + $0x8] sm:$0xff]  ;;  %v739_v16 = vld [vmem:[%s3082_s3] sm:$0xff] }
  0x76   : > { %v1100_v48 = vld [vmem:[#allocation10 + $0x18] sm:$0xff]  ;;  %v1099_v50 = vld [vmem:[#allocation10 + $0x10] sm:$0xff]  ;;  %v1098_v52 = vld [vmem:[#allocation10 + $0x8] sm:$0xff] }
  0x77   : > { %782 = vmatpush.msra.mxu2 %v763_v3  ;;  %733 = vmatpush.msra.mxu1 %v712_v11  ;;  %v1073_v49 = vld [vmem:[#allocation8 + $0x18] sm:$0xff]  ;;  %v1072_v51 = vld [vmem:[#allocation8 + $0x10] sm:$0xff]  ;;  %v1071_v54 = vld [vmem:[#allocation8 + $0x8] sm:$0xff] }
  0x78   : > { %1826 = vmatmul.msk.f32.vlgmr.msra.gmra.mxu2 %vm715_vm0, %v709_v4  ;;  %v1127_v53 = vld [vmem:[#allocation11 + $0x18] sm:$0xff]  ;;  %v1097_v55 = vld [vmem:[#allocation10] sm:$0xff]  ;;  %v1126_v56 = vld [vmem:[#allocation11 + $0x10] sm:$0xff] }
  0x79   : > { %1031 = vmatpush.msrb.mxu2 %v1015_v5  ;;  %734 = vmatpush.msra.mxu1 %v711_v12  ;;  %v2011_v32 = vpop.eup %2010  ;;  %v710_v57 = vld [vmem:[%s609_s19] sm:$0xff]  ;;  %v1070_v58 = vld [vmem:[#allocation8] sm:$0xff]  ;;  %v1125_v59 = vld [vmem:[#allocation11 + $0x8] sm:$0xff]  ;;  %s1551_s5 = scalar_lea.hbm %s3138_s8, %s1866_s25 }
  0x7a   : > { %1824 = vmatmul.msk.f32.vlgmr.msra.gmra.mxu1 %vm715_vm0, %v709_v4  ;;  %v1045_v33 = vmul.f32 32.0, %v2011_v32  ;;  %vm1049_vm2 = vweird.f32 %v2011_v32  ;;  %v1124_v60 = vld [vmem:[#allocation11] sm:$0xff]  ;;  %v1375_v11 = vld [vmem:[#allocation13 + $0x18] sm:$0xff]  ;;  %v1374_v12 = vld [vmem:[#allocation13 + $0x10] sm:$0xff]  ;;  %s1554_s6 = sshll.u32 %s1551_s5, 4  ;;  %s1555_s6 = int_to_ptr.hbm [resolvable:$true] %s1554_s6 }
  0x7b   : > { %1032 = vmatpush.msrb.mxu2 %v1014_v6  ;;  %755 = vmatpush.msrb.mxu1 %v742_v13  ;;  %v1373_v13 = vld [vmem:[#allocation13 + $0x8] sm:$0xff] }
  0x7c   : > { %v1046_v34 = vsub.f32 1.0, %v1045_v33 }
  0x7d   : > { %1033 = vmatpush.msrb.mxu2 %v1013_v7  ;;  %756 = vmatpush.msrb.mxu1 %v741_v14  ;;  %v1372_v14 = vld [vmem:[#allocation13] sm:$0xff] }
  0x7e   : > { %v1047_v35 = vmul.f32 %v2011_v32, %v1046_v34 }
  0x7f   : > { %1034 = vmatpush.msrb.mxu2 %v1012_v8  ;;  %757 = vmatpush.msrb.mxu1 %v740_v15 }
  0x80   : > { %v1048_v36 = vadd.f32 %v2011_v32, %v1047_v35 }
  0x81   : > { %758 = vmatpush.msrb.mxu1 %v739_v16 }
  0x82   : > { %1825 = vmatmul.msk.f32.vlgmr.msrb.gmra.mxu1 %vm715_vm0, %v709_v4  ;;  %v2824_v39 = vsel %vm1049_vm2, %v2011_v32, %v1048_v36 }
  0xf7   : > { %v736_v25 = vpop.f32.mrf.mxu1 }
  0xf8   : > { %840 = vrot.lane.b32.xlu2 %v736_v25, %s2477_s27 }
  0xfb   : > { %v784_v17 = vpop.f32.mrf.mxu2 }
  0xfc   : > { %v1005_v18 = vsel %vm715_vm0, %v784_v17, 0.0 }
  0xfd   : > { %v1006_v19 = vrot.slane %v1005_v18, 4 }
  0xff   : > { %v1007_v20 = vadd.f32 %v1006_v19, %v1005_v18  ;;  %v760_v26 = vpop.f32.mrf.mxu1 }
 0x100   : > { %842 = vrot.lane.b32.xlu1 %v760_v26, %s2477_s27  ;;  %1827 = vmatpush.xpose.msk.msra.mxu3 %vm787_vm1, %v760_v26 }
 0x101   : > { %v1008_v21 = vrot.slane %v1007_v20, 2  ;;  %897 = vrot.lane.b32.xlu2 %v760_v26, %s2479_s30 }
 0x103   : > { %v1009_v22 = vadd.f32 %v1008_v21, %v1007_v20  ;;  %1828 = vmatmul.msk.f32.vlgmr.msra.gmra.mxu3 %vm787_vm1, %v736_v25 }
 0x105   : > { %v1010_v23 = vrot.slane %v1009_v22, 1 }
 0x107   : > { %v1011_v24 = vadd.f32 %v1010_v23, %v1009_v22 }
 0x108   : > { %952 = vrot.lane.b32.xlu1 %v760_v26, %s2478_s0 }
 0x109   : > { %1838 = vmatmul.msk.f32.vlgmr.msrb.gmra.mxu2 %vm715_vm0, %v1011_v24 }
 0x110   : > { %895 = vrot.lane.b32.xlu1 %v736_v25, %s2479_s30 }
 0x152   : > { %v841_v38 = vpop.permute.xlu2 %840 }
 0x15b   : > { %v898_v43 = vpop.permute.xlu2 %897 }
 0x15c   : > { %1832 = vmatpush.xpose.msk.msra.mxu0 %vm787_vm1, %v898_v43 }
 0x160   : > { %1116 = vmatpush.msrb.mxu0 %v1100_v48 }
 0x162   : > { %1117 = vmatpush.msrb.mxu0 %v1099_v50 }
 0x164   : > { %1118 = vmatpush.msrb.mxu0 %v1098_v52 }
 0x166   : > { %1119 = vmatpush.msrb.mxu0 %v1097_v55 }
 0x172   : > { %v843_v37 = vpop.permute.xlu1 %842 }
 0x173   : > { %1829 = vmatpush.xpose.msk.msrb.mxu3 %vm787_vm1, %v843_v37 }
 0x176   : > { %1830 = vmatmul.msk.f32.vlgmr.msrb.gmra.mxu3 %vm787_vm1, %v841_v38 }
 0x177   : > { %1089 = vmatpush.msra.mxu3 %v1073_v49 }
 0x179   : > { %1090 = vmatpush.msra.mxu3 %v1072_v51 }
 0x17a   : > { %v953_v44 = vpop.permute.xlu1 %952 }
 0x17b   : > { %1835 = vmatpush.xpose.msk.msra.mxu1 %vm787_vm1, %v953_v44  ;;  %1091 = vmatpush.msra.mxu3 %v1071_v54 }
 0x17d   : > { %1092 = vmatpush.msra.mxu3 %v1070_v58  ;;  %v1424_v58 = vld [vmem:[#allocation14 + $0x8] sm:$0xff] }
 0x17f   : > { %1140 = vmatpush.msrb.mxu1 %v1127_v53 }
 0x181   : > { %1141 = vmatpush.msrb.mxu1 %v1126_v56  ;;  %v1426_v56 = vld [vmem:[#allocation14 + $0x18] sm:$0xff] }
 0x182   : > { %v896_v47 = vpop.permute.xlu1 %895 }
 0x183   : > { %1833 = vmatmul.msk.f32.vlgmr.msra.gmra.mxu0 %vm787_vm1, %v896_v47  ;;  %1142 = vmatpush.msrb.mxu1 %v1125_v59  ;;  %v1423_v59 = vld [vmem:[#allocation14] sm:$0xff] }
 0x185   : > { %1143 = vmatpush.msrb.mxu1 %v1124_v60 }
 0x186   : > { %v811_v15 = vpop.f32.mrf.mxu3 }
 0x18b   : > { %1840 = vmatmul.msk.f32.vlgmr.msrb.gmra.mxu0 %vm715_vm0, %v710_v57 }
 0x18c   : > { %v1036_v27 = vpop.f32.mrf.mxu2 }
 0x18d   : > { %v1039_v28 = vperm.slane %v1036_v27, 0  ;;  %v814_v27 = vmul.f32 0.35355338, %v811_v15 }
 0x18f   : > { %v1040_v29 = vadd.f32 %v1039_v28, %v709_v4  ;;  %v815_v28 = vsel %vm787_vm1, %v814_v27, -inf }
 0x191   : > { %v1041_v30 = vsel %vm715_vm0, %v1040_v29, 0.0 }
 0x192   : > { %1042 = vadd.xlane.f32.xlu0 %v1041_v30 }
 0x1f9   : > { %v865_v17 = vpop.f32.mrf.mxu3 }
 0x1fa   : > { %v2865_v43 = vmul.f32 0.35355338, %v865_v17 }
 0x1fc   : > { %v869_v44 = vsel %vm787_vm1, %v2865_v43, -inf }
 0x200   : > { %v2840_v9 = vpop.f32.mrf.mxu0 }
 0x201   : > { %v2878_v54 = vmul.f32 0.35355338, %v2840_v9 }
 0x203   : > { %v924_v55 = vsel %vm787_vm1, %v2878_v54, -inf }
 0x205   : > { %v1043_v40 = vpop.xlane.xlu0 %1042 }
 0x206   : > { %v1051_v41 = vmul.f32 %v2824_v39, %v1043_v40 }
 0x208   : > { %v1052_v42 = vsub.f32 %v1040_v29, %v1051_v41  ;;  %v1121_v10 = vpop.f32.mrf.mxu0 }
 0x209   : > { %1842 = vmatpush.xpose.msk.msra.mxu2 %vm787_vm1, %v1121_v10 }
 0x20a   : > { %v1053_v45 = vmul.f32 %v1052_v42, %v1052_v42 }
 0x20c   : > { %v1054_v46 = vsel %vm715_vm0, %v1053_v45, 0.0 }
 0x20d   : > { %1055 = vadd.xlane.f32.xlu0 %v1054_v46  ;;  %1391 = vmatpush.msrb.mxu2 %v1375_v11 }
 0x20f   : > { %1392 = vmatpush.msrb.mxu2 %v1374_v12 }
 0x211   : > { %1393 = vmatpush.msrb.mxu2 %v1373_v13 }
 0x213   : > { %1394 = vmatpush.msrb.mxu2 %v1372_v14 }
 0x221   : > { %950 = vrot.lane.b32.xlu0 %v736_v25, %s2478_s0 }
 0x229   : > { %1202 = vrot.lane.b32.xlu0 %v1121_v10, %s2477_s27 }
 0x280   : > { %v1056_v61 = vpop.xlane.xlu0 %1055 }
 0x281   : > { %v1057_v62 = vmul.f32 %v1056_v61, %v2824_v39 }
 0x283   : > { %v1058_v63 = vadd.f32 1e-05, %v1057_v62 }
 0x285   : > { %2012 = vrsqrt.f32 %v1058_v63  ;;  %vm1065_vm4 = vweird.f32 %v1058_v63 }
 0x28b   : > { %v2013_v0 = vpop.eup %2012 }
 0x28c   : > { %v1060_v1 = vmul.f32 %v2013_v0, %v1058_v63  ;;  %vm1066_vm3 = vweird.f32 %v2013_v0 }
 0x28d   : > { %vm1067_vm5 = vmor %vm1065_vm4, %vm1066_vm3 }
 0x28e   : > { %v1061_v2 = vmul.f32 %v2013_v0, %v1060_v1 }
 0x290   : > { %v1062_v3 = vmul.f32 0.5, %v1061_v2 }
 0x292   : > { %v1063_v4 = vsub.f32 1.5, %v1062_v3 }
 0x293   : > { %v951_v5 = vpop.permute.xlu0 %950 }
 0x294   : > { %v1064_v6 = vmul.f32 %v2013_v0, %v1063_v4  ;;  %1836 = vmatmul.msk.f32.vlgmr.msra.gmra.mxu1 %vm787_vm1, %v951_v5 }
 0x296   : > { %v1068_v7 = vsel %vm1067_vm5, %v2013_v0, %v1064_v6 }
 0x297   : > { %v1069_v8 = vmul.f32 %v1068_v7, %v1052_v42 }
 0x299   : > { %1839 = vmatmul.msk.f32.vlgmr.msra.gmra.mxu3 %vm715_vm0, %v1069_v8 }
 0x29b   : > { %v1203_v31 = vpop.permute.xlu0 %1202 }
 0x29c   : > { %1841 = vmatmul.msk.f32.vlgmr.msrb.gmra.mxu1 %vm715_vm0, %v710_v57  ;;  %1844 = vmatpush.xpose.msk.msrb.mxu3 %vm787_vm1, %v1203_v31  ;;  %v1425_v57 = vld [vmem:[#allocation14 + $0x10] sm:$0xff] }
 0x2a0   : > { %1446 = vmatpush.msra.mxu3 %v1426_v56 }
 0x2a2   : > { %1447 = vmatpush.msra.mxu3 %v1425_v57  ;;  %v2008_v57 = vld [vmem:[%s3090_s11] ss:$0 sm:$0xff] }
 0x2a4   : > { %1448 = vmatpush.msra.mxu3 %v1424_v58 }
 0x2a6   : > { %1449 = vmatpush.msra.mxu3 %v1423_v59 }
 0x311   : > { %v975_v16 = vpop.f32.mrf.mxu1 }
 0x312   : > { %v2851_v29 = vmul.f32 0.35355338, %v975_v16 }
 0x314   : > { %v979_v30 = vsel %vm787_vm1, %v2851_v29, -inf }
 0x319   : > { %v1145_v18 = vpop.f32.mrf.mxu1 }
 0x31a   : > { %v1365_v19 = vsel %vm715_vm0, %v1145_v18, 0.0 }
 0x31b   : > { %v1366_v20 = vrot.slane %v1365_v19, 4 }
 0x31c   : > { %v1094_v21 = vpop.f32.mrf.mxu3 }
 0x31d   : > { %v1367_v22 = vadd.f32 %v1366_v20, %v1365_v19  ;;  %1200 = vrot.lane.b32.xlu0 %v1094_v21, %s2477_s27  ;;  %1843 = vmatmul.msk.f32.vlgmr.msra.gmra.mxu2 %vm787_vm1, %v1094_v21  ;;  %s1568_s27 = scalar_lea.hbm %s3139_s16, %s1866_s25 }
 0x31f   : > { %v1368_v23 = vrot.slane %v1367_v22, 2 }
 0x321   : > { %v1369_v24 = vadd.f32 %v1368_v23, %v1367_v22  ;;  %v1461_v22 = vld [vmem:[%s3091_s12 + $0x30] sm:$0xff]  ;;  %v1460_v23 = vld [vmem:[%s3091_s12 + $0x28] sm:$0xff] }
 0x323   : > { %v1370_v25 = vrot.slane %v1369_v24, 1 }
 0x325   : > { %v1371_v26 = vadd.f32 %v1370_v25, %v1369_v24  ;;  %1257 = vrot.lane.b32.xlu0 %v1121_v10, %s2479_s30  ;;  %v1459_v24 = vld [vmem:[%s3091_s12 + $0x20] sm:$0xff]  ;;  %v1458_v25 = vld [vmem:[%s3091_s12 + $0x18] sm:$0xff] }
 0x327   : > { %1853 = vmatmul.msk.f32.vlgmr.msrb.gmra.mxu2 %vm715_vm0, %v1371_v26 }
 0x32d   : > { %1312 = vrot.lane.b32.xlu0 %v1121_v10, %s2478_s0 }
 0x357   : > { %816 = vmax.xlane.f32.xlu0 %v815_v28  ;;  %v1456_v28 = vld [vmem:[%s3091_s12 + $0x8] sm:$0xff] }
 0x35f   : > { %980 = vmax.xlane.f32.xlu0 %v979_v30 }
 0x38f   : > { %v1201_v32 = vpop.permute.xlu0 %1200 }
 0x390   : > { %1845 = vmatmul.msk.f32.vlgmr.msrb.gmra.mxu3 %vm787_vm1, %v1201_v32 }
 0x397   : > { %v1258_v33 = vpop.permute.xlu0 %1257 }
 0x398   : > { %1847 = vmatpush.xpose.msk.msra.mxu0 %vm787_vm1, %v1258_v33 }
 0x39f   : > { %v1313_v34 = vpop.permute.xlu0 %1312 }
 0x3a0   : > { %v1171_v35 = vpop.f32.mrf.mxu2  ;;  %1850 = vmatpush.xpose.msk.msra.mxu1 %vm787_vm1, %v1313_v34 }
 0x3a1   : > { %v2859_v36 = vmul.f32 0.35355338, %v1171_v35 }
 0x3a3   : > { %v1175_v37 = vsel %vm787_vm1, %v2859_v36, -inf }
 0x3a4   : > { %1176 = vmax.xlane.f32.xlu0 %v1175_v37 }
 0x3aa   : > { %v1396_v38 = vpop.f32.mrf.mxu2 }
 0x3ab   : > { %v1399_v40 = vperm.slane %v1396_v38, 0 }
 0x3ad   : > { %v1400_v41 = vadd.f32 %v1399_v40, %v1069_v8 }
 0x3af   : > { %v1401_v42 = vsel %vm715_vm0, %v1400_v41, 0.0 }
 0x3b0   : > { %1402 = vadd.xlane.f32.xlu2 %v1401_v42 }
 0x3c8   : > { %1255 = vrot.lane.b32.xlu2 %v1094_v21, %s2479_s30  ;;  %s1822_s30 = sshll.u32 %s2739_s23, 5 }
 0x3c9   : > { %s2938_s9 = scalar_lea.vmem [#allocation18], %s1822_s30  ;;  %s2954_s15 = scalar_lea.vmem [#allocation20], %s1822_s30 }
 0x3ca   : > { %v817_v60 = vpop.xlane.xlu0 %816  ;;  %s1552_s13 = sshll.u32 %s2938_s9, 4  ;;  %s2334_s30 = sshra.s32 %s1555_s6, 4  ;;  %s2994_s13 = int_to_ptr.vmem [resolvable:$true] %s1552_s13  ;;  %s2335_s30 = int_to_ptr.hbm [resolvable:$true] %s2334_s30 }
 0x3cb   : > { %v818_v0 = vsub.f32 %v814_v27, %v817_v60  ;;  %v1457_v27 = vld [vmem:[%s3091_s12 + $0x10] sm:$0xff]  ;;  %s2336_s19 = scalar_lea.hbm %s2335_s30, 32  ;;  %p2341_p7 = scmp.lt.s32.totalorder %s2335_s30, %s3138_s8 }
 0x3cc   : > { %p2337_p1 = scmp.ne.s32.totalorder %s2335_s30, %s2336_s19 }
 0x3cd   : > { %v819_v1 = vmul.f32 1.442695, %v818_v0 }
 0x3ce   : > { %p2338_p3 = pnand %p2337_p1, %p2686_p0 }
 0x3d0   : > { %p2339_p13 = pneg %p2338_p3 }
 0x3d2   : > { %v981_v2 = vpop.xlane.xlu0 %980 }
 0x3d3   : > { %v982_v7 = vsub.f32 %v2851_v29, %v981_v2  ;;  %v1455_v29 = vld [vmem:[%s3091_s12] sm:$0xff] }
 0x3d5   : > { %v983_v11 = vmul.f32 1.442695, %v982_v7 }
 0x3f1   : > { %870 = vmax.xlane.f32.xlu2 %v869_v44 }
 0x413   : > { %v1225_v45 = vpop.f32.mrf.mxu3 }
 0x414   : > { %v2869_v46 = vmul.f32 0.35355338, %v1225_v45 }
 0x416   : > { %v1229_v47 = vsel %vm787_vm1, %v2869_v46, -inf }
 0x417   : > { %1230 = vmax.xlane.f32.xlu2 %v1229_v47  ;;  %v1177_v26 = vpop.xlane.xlu0 %1176 }
 0x423   : > { %v1403_v48 = vpop.xlane.xlu2 %1402 }
 0x424   : > { %v1404_v49 = vmul.f32 %v1403_v48, %v2824_v39 }
 0x426   : > { %v1405_v50 = vsub.f32 %v1400_v41, %v1404_v49 }
 0x428   : > { %v1406_v51 = vmul.f32 %v1405_v50, %v1405_v50 }
 0x42a   : > { %v1407_v52 = vsel %vm715_vm0, %v1406_v51, 0.0 }
 0x42b   : > { %1408 = vadd.xlane.f32.xlu1 %v1407_v52  ;;  %v1256_v53 = vpop.permute.xlu2 %1255  ;;  %v1178_v52 = vsub.f32 %v2859_v36, %v1177_v26 }
 0x42c   : > { %1848 = vmatmul.msk.f32.vlgmr.msra.gmra.mxu0 %vm787_vm1, %v1256_v53 }
 0x42d   : > { %v1179_v36 = vmul.f32 1.442695, %v1178_v52 }
 0x444   : > { %1310 = vrot.lane.b32.xlu1 %v1094_v21, %s2478_s0  ;;  %v1462_v21 = vld [vmem:[%s3091_s12 + $0x38] sm:$0xff]  ;;  %s3004_s0 = scalar_lea.sflag [#allocation19], %s605_s24 }
 0x445   : > { %1479 = vmatpush.msrb.mxu0 %v1462_v21 }
 0x447   : > { %1480 = vmatpush.msrb.mxu0 %v1461_v22 }
 0x449   : > { %1481 = vmatpush.msrb.mxu0 %v1460_v23 }
 0x44b   : > { %1482 = vmatpush.msrb.mxu0 %v1459_v24 }
 0x44d   : > { %1483 = vmatpush.msrb.mxu0 %v1458_v25 }
 0x44f   : > { %1484 = vmatpush.msrb.mxu0 %v1457_v27 }
 0x451   : > { %1485 = vmatpush.msrb.mxu0 %v1456_v28 }
 0x453   : > { %1486 = vmatpush.msrb.mxu0 %v1455_v29 }
 0x464   : > { %v871_v35 = vpop.xlane.xlu2 %870 }
 0x465   : > { %v872_v38 = vsub.f32 %v2865_v43, %v871_v35 }
 0x467   : > { %v873_v44 = vmul.f32 1.442695, %v872_v38  ;;  %v2009_v38 = vld [vmem:[#allocation16] ss:$0 sm:$0xff] }
 0x46e   : > { %925 = vmax.xlane.f32.xlu1 %v924_v55 }
 0x49e   : > { %v1409_v61 = vpop.xlane.xlu1 %1408 }
 0x49f   : > { %v1410_v62 = vmul.f32 %v1409_v61, %v2824_v39 }
 0x4a1   : > { %v1411_v63 = vadd.f32 1e-05, %v1410_v62 }
 0x4a3   : > { %2014 = vrsqrt.f32 %v1411_v63  ;;  %vm1418_vm7 = vweird.f32 %v1411_v63 }
 0x4a4   : > { %2016 = vpow2.f32 %v819_v1 }
 0x4a5   : > { %2018 = vpow2.f32 %v983_v11 }
 0x4a9   : > { %v2015_v3 = vpop.eup %2014  ;;  %v1280_v4 = vpop.f32.mrf.mxu0 }
 0x4aa   : > { %v1413_v5 = vmul.f32 %v2015_v3, %v1411_v63  ;;  %v1283_v6 = vmul.f32 0.35355338, %v1280_v4  ;;  %vm1419_vm6 = vweird.f32 %v2015_v3  ;;  %v2885_v13 = vpop.eup %2016 }
 0x4ab   : > { %vm1420_vm8 = vmor %vm1418_vm7, %vm1419_vm6  ;;  %v821_v16 = vsel %vm787_vm1, %v2885_v13, 0.0  ;;  %v2894_v19 = vpop.eup %2018 }
 0x4ac   : > { %v1414_v8 = vmul.f32 %v2015_v3, %v1413_v5  ;;  %v1284_v9 = vsel %vm787_vm1, %v1283_v6, -inf  ;;  %v985_v20 = vsel %vm787_vm1, %v2894_v19, 0.0 }
 0x4ad   : > { %1285 = vmax.xlane.f32.xlu0 %v1284_v9 }
 0x4ae   : > { %v1415_v10 = vmul.f32 0.5, %v1414_v8 }
 0x4b0   : > { %v1416_v12 = vsub.f32 1.5, %v1415_v10 }
 0x4b2   : > { %v1417_v14 = vmul.f32 %v2015_v3, %v1416_v12 }
 0x4b4   : > { %v1421_v15 = vsel %vm1420_vm8, %v2015_v3, %v1417_v14 }
 0x4b5   : > { %v2889_v17 = vmul.f32 %v1421_v15, %v1405_v50  ;;  %822 = vadd.xlane.f32.xlu0 %v821_v16  ;;  %v1231_v15 = vpop.xlane.xlu2 %1230 }
 0x4b6   : > { %v1311_v18 = vpop.permute.xlu1 %1310  ;;  %v1232_v52 = vsub.f32 %v2869_v46, %v1231_v15 }
 0x4b7   : > { %1851 = vmatmul.msk.f32.vlgmr.msra.gmra.mxu1 %vm787_vm1, %v1311_v18  ;;  %1854 = vmatmul.msk.f32.vlgmr.msra.gmra.mxu3 %vm715_vm0, %v2889_v17 }
 0x4bd   : > { %986 = vadd.xlane.f32.xlu0 %v985_v20 }
 0x520   : > { %v1286_v30 = vpop.xlane.xlu0 %1285 }
 0x521   : > { %v1287_v31 = vsub.f32 %v1283_v6, %v1286_v30 }
 0x523   : > { %v1288_v32 = vmul.f32 1.442695, %v1287_v31 }
 0x525   : > { %2020 = vpow2.f32 %v1288_v32  ;;  %v926_v32 = vpop.xlane.xlu1 %925 }
 0x528   : > { %v823_v33 = vpop.xlane.xlu0 %822 }
 0x529   : > { %2022 = vrcp.f32 %v823_v33  ;;  %v835_v47 = vand.u32 2147483648, %v823_v33  ;;  %v833_v49 = vand.u32 2147483647, %v823_v33  ;;  %vm829_vm10 = vweird.f32 %v823_v33 }
 0x52b   : > { %v2922_v34 = vpop.eup %2020  ;;  %v836_v43 = vor.u32 1.1754944e-38, %v835_v47  ;;  %vm834_vm12 = vcmp.eq.f32.partialorder %v833_v49, 8.507059e+37 }
 0x52c   : > { %v1290_v37 = vsel %vm787_vm1, %v2922_v34, 0.0 }
 0x52d   : > { %1291 = vadd.xlane.f32.xlu0 %v1290_v37  ;;  %v927_v37 = vsub.f32 %v2878_v54, %v926_v32 }
 0x52f   : > { %v2023_v40 = vpop.eup %2022 }
 0x530   : > { %v825_v41 = vmul.f32 %v2023_v40, %v823_v33  ;;  %v987_v42 = vpop.xlane.xlu0 %986  ;;  %vm830_vm9 = vweird.f32 %v2023_v40 }
 0x531   : > { %2024 = vrcp.f32 %v987_v42  ;;  %vm831_vm11 = vmor %vm829_vm10, %vm830_vm9  ;;  %v999_v0 = vand.u32 2147483648, %v987_v42  ;;  %v997_v4 = vand.u32 2147483647, %v987_v42  ;;  %vm993_vm15 = vweird.f32 %v987_v42 }
 0x532   : > { %v826_v45 = vsub.f32 1.0, %v825_v41  ;;  %2026 = vpow2.f32 %v873_v44 }
 0x533   : > { %2028 = vpow2.f32 %v1179_v36  ;;  %v1000_v7 = vor.u32 1.1754944e-38, %v999_v0  ;;  %vm998_vm3 = vcmp.eq.f32.partialorder %v997_v4, 8.507059e+37 }
 0x534   : > { %v827_v48 = vmul.f32 %v2023_v40, %v826_v45  ;;  %v1335_v50 = vpop.f32.mrf.mxu1 }
 0x535   : > { %v1338_v51 = vmul.f32 0.35355338, %v1335_v50 }
 0x536   : > { %v828_v53 = vadd.f32 %v2023_v40, %v827_v48 }
 0x537   : > { %v2025_v55 = vpop.eup %2024  ;;  %v1339_v56 = vsel %vm787_vm1, %v1338_v51, -inf }
 0x538   : > { %v832_v58 = vsel %vm831_vm11, %v2023_v40, %v828_v53  ;;  %v989_v59 = vmul.f32 %v2025_v55, %v987_v42  ;;  %1340 = vmax.xlane.f32.xlu2 %v1339_v56  ;;  %v2934_v2 = vpop.eup %2026  ;;  %vm994_vm13 = vweird.f32 %v2025_v55  ;;  %v928_v42 = vmul.f32 1.442695, %v927_v37 }
 0x539   : > { %v837_v60 = vsel %vm834_vm12, %v836_v43, %v832_v58  ;;  %vm995_vm2 = vmor %vm993_vm15, %vm994_vm13  ;;  %v875_v8 = vsel %vm787_vm1, %v2934_v2, 0.0  ;;  %v2945_v12 = vpop.eup %2028  ;;  %v1233_v58 = vmul.f32 1.442695, %v1232_v52 }
 0x53a   : > { %v838_v61 = vmul.f32 %v2885_v13, %v837_v60  ;;  %v990_v62 = vsub.f32 1.0, %v989_v59  ;;  %v1451_v63 = vpop.f32.mrf.mxu3  ;;  %v1181_v13 = vsel %vm787_vm1, %v2945_v12, 0.0 }
 0x53b   : > { %v1452_v1 = vadd.f32 %v2008_v57, %v1451_v63 }
 0x53c   : > { %839 = vst.msk [vmem:[%s2938_s9] sm:$0xff] %vm787_vm1, %v838_v61  ;;  %v991_v3 = vmul.f32 %v2025_v55, %v990_v62 }
 0x53d   : > { %v1454_v5 = vmax.f32 %v1452_v1, 0.0 }
 0x53e   : > { %v992_v6 = vadd.f32 %v2025_v55, %v991_v3 }
 0x53f   : > { %1855 = vmatmul.msk.f32.vlgmr.msrb.gmra.mxu0 %vm1467_vm14, %v1454_v5 }
 0x540   : > { %v996_v9 = vsel %vm995_vm2, %v2025_v55, %v992_v6  ;;  %876 = vadd.xlane.f32.xlu2 %v875_v8 }
 0x541   : > { %v1001_v10 = vsel %vm998_vm3, %v1000_v7, %v996_v9 }
 0x542   : > { %v1002_v11 = vmul.f32 %v2894_v19, %v1001_v10 }
 0x544   : > { %1837 = vst.msk [vmem:[%s2938_s9 + $0x18] sm:$0xff] %vm787_vm1, %v1002_v11 }
 0x548   : > { %1182 = vadd.xlane.f32.xlu2 %v1181_v13 }
 0x5a0   : > { %v1292_v14 = vpop.xlane.xlu0 %1291 }
 0x5a1   : > { %2030 = vrcp.f32 %v1292_v14  ;;  %v1304_v21 = vand.u32 2147483648, %v1292_v14  ;;  %v1302_v19 = vand.u32 2147483647, %v1292_v14  ;;  %vm1298_vm5 = vweird.f32 %v1292_v14 }
 0x5a3   : > { %v1305_v27 = vor.u32 1.1754944e-38, %v1304_v21  ;;  %vm1303_vm7 = vcmp.eq.f32.partialorder %v1302_v19, 8.507059e+37 }
 0x5a7   : > { %v2031_v16 = vpop.eup %2030 }
 0x5a8   : > { %v1294_v18 = vmul.f32 %v2031_v16, %v1292_v14  ;;  %vm1299_vm4 = vweird.f32 %v2031_v16 }
 0x5a9   : > { %vm1300_vm6 = vmor %vm1298_vm5, %vm1299_vm4 }
 0x5aa   : > { %v1295_v20 = vsub.f32 1.0, %v1294_v18 }
 0x5ab   : > { %v1341_v22 = vpop.xlane.xlu2 %1340 }
 0x5ac   : > { %v1296_v23 = vmul.f32 %v2031_v16, %v1295_v20  ;;  %v1342_v24 = vsub.f32 %v1338_v51, %v1341_v22 }
 0x5ae   : > { %v1297_v25 = vadd.f32 %v2031_v16, %v1296_v23  ;;  %v1343_v26 = vmul.f32 1.442695, %v1342_v24 }
 0x5b0   : > { %v1301_v28 = vsel %vm1300_vm6, %v2031_v16, %v1297_v25  ;;  %2032 = vpow2.f32 %v1343_v26 }
 0x5b1   : > { %v1306_v29 = vsel %vm1303_vm7, %v1305_v27, %v1301_v28 }
 0x5b2   : > { %v1307_v30 = vmul.f32 %v2922_v34, %v1306_v29 }
 0x5b3   : > { %v877_v31 = vpop.xlane.xlu2 %876 }
 0x5b4   : > { %1849 = vst.msk [vmem:[%s2954_s15 + $0x10] sm:$0xff] %vm787_vm1, %v1307_v30  ;;  %2034 = vrcp.f32 %v877_v31  ;;  %v889_v48 = vand.u32 2147483648, %v877_v31  ;;  %v887_v50 = vand.u32 2147483647, %v877_v31  ;;  %vm883_vm9 = vweird.f32 %v877_v31 }
 0x5b6   : > { %v2958_v33 = vpop.eup %2032  ;;  %v890_v43 = vor.u32 1.1754944e-38, %v889_v48  ;;  %vm888_vm11 = vcmp.eq.f32.partialorder %v887_v50, 8.507059e+37 }
 0x5b7   : > { %v1345_v35 = vsel %vm787_vm1, %v2958_v33, 0.0 }
 0x5b8   : > { %1346 = vadd.xlane.f32.xlu2 %v1345_v35 }
 0x5ba   : > { %v2035_v40 = vpop.eup %2034 }
 0x5bb   : > { %v879_v34 = vmul.f32 %v2035_v40, %v877_v31  ;;  %v1183_v41 = vpop.xlane.xlu2 %1182  ;;  %vm884_vm8 = vweird.f32 %v2035_v40 }
 0x5bc   : > { %2036 = vrcp.f32 %v1183_v41  ;;  %v1488_v44 = vpop.f32.mrf.mxu0  ;;  %vm885_vm10 = vmor %vm883_vm9, %vm884_vm8  ;;  %v1195_v46 = vand.u32 2147483648, %v1183_v41  ;;  %v1193_v62 = vand.u32 2147483647, %v1183_v41  ;;  %vm1189_vm13 = vweird.f32 %v1183_v41 }
 0x5bd   : > { %v880_v45 = vsub.f32 1.0, %v879_v34  ;;  %v1489_v47 = vadd.f32 %v2009_v38, %v1488_v44  ;;  %2038 = vpow2.f32 %v928_v42 }
 0x5be   : > { %2040 = vpow2.f32 %v1233_v58  ;;  %v1196_v1 = vor.u32 1.1754944e-38, %v1195_v46  ;;  %vm1194_vm15 = vcmp.eq.f32.partialorder %v1193_v62, 8.507059e+37 }
 0x5bf   : > { %v881_v49 = vmul.f32 %v2035_v40, %v880_v45  ;;  %v1491_v51 = vadd.f32 %v1489_v47, %v2889_v17 }
 0x5c1   : > { %v882_v54 = vadd.f32 %v2035_v40, %v881_v49  ;;  %v1492_v53 = vsel %vm715_vm0, %v1491_v51, 0.0 }
 0x5c2   : > { %v2037_v55 = vpop.eup %2036  ;;  %1493 = vadd.xlane.f32.xlu1 %v1492_v53 }
 0x5c3   : > { %v886_v56 = vsel %vm885_vm10, %v2035_v40, %v882_v54  ;;  %v1185_v57 = vmul.f32 %v2037_v55, %v1183_v41  ;;  %v2967_v36 = vpop.eup %2038  ;;  %vm1190_vm12 = vweird.f32 %v2037_v55 }
 0x5c4   : > { %v891_v59 = vsel %vm888_vm11, %v890_v43, %v886_v56  ;;  %v930_v0 = vsel %vm787_vm1, %v2967_v36, 0.0  ;;  %vm1191_vm14 = vmor %vm1189_vm13, %vm1190_vm12  ;;  %v2974_v5 = vpop.eup %2040 }
 0x5c5   : > { %v892_v60 = vmul.f32 %v2934_v2, %v891_v59  ;;  %v1186_v17 = vsub.f32 1.0, %v1185_v57  ;;  %v1235_v6 = vsel %vm787_vm1, %v2974_v5, 0.0 }
 0x5c7   : > { %1831 = vst.msk [vmem:[%s2938_s9 + $0x8] sm:$0xff] %vm787_vm1, %v892_v60  ;;  %v1187_v61 = vmul.f32 %v2037_v55, %v1186_v17 }
 0x5c9   : > { %v1188_v63 = vadd.f32 %v2037_v55, %v1187_v61 }
 0x5ca   : > { %931 = vadd.xlane.f32.xlu1 %v930_v0 }
 0x5cb   : > { %v1192_v2 = vsel %vm1191_vm14, %v2037_v55, %v1188_v63 }
 0x5cc   : > { %v1197_v3 = vsel %vm1194_vm15, %v1196_v1, %v1192_v2 }
 0x5cd   : > { %v1198_v4 = vmul.f32 %v2945_v12, %v1197_v3 }
 0x5cf   : > { %1199 = vst.msk [vmem:[%s2954_s15] sm:$0xff] %vm787_vm1, %v1198_v4 }
 0x5d2   : > { %1236 = vadd.xlane.f32.xlu1 %v1235_v6 }
 0x62b   : > { %v1347_v7 = vpop.xlane.xlu2 %1346 }
 0x62c   : > { %2042 = vrcp.f32 %v1347_v7  ;;  %v1359_v13 = vand.u32 2147483648, %v1347_v7  ;;  %v1357_v12 = vand.u32 2147483647, %v1347_v7  ;;  %vm1353_vm3 = vweird.f32 %v1347_v7 }
 0x62e   : > { %v1360_v20 = vor.u32 1.1754944e-38, %v1359_v13  ;;  %vm1358_vm5 = vcmp.eq.f32.partialorder %v1357_v12, 8.507059e+37 }
 0x632   : > { %v2043_v8 = vpop.eup %2042 }
 0x633   : > { %v1349_v9 = vmul.f32 %v2043_v8, %v1347_v7  ;;  %vm1354_vm2 = vweird.f32 %v2043_v8 }
 0x634   : > { %vm1355_vm4 = vmor %vm1353_vm3, %vm1354_vm2 }
 0x635   : > { %v1350_v10 = vsub.f32 1.0, %v1349_v9  ;;  %v1494_v11 = vpop.xlane.xlu1 %1493 }
 0x636   : > { %v1495_v14 = vmul.f32 %v1494_v11, %v2824_v39 }
 0x637   : > { %v1351_v15 = vmul.f32 %v2043_v8, %v1350_v10 }
 0x638   : > { %v2981_v16 = vsub.f32 %v1491_v51, %v1495_v14 }
 0x639   : > { %v1352_v18 = vadd.f32 %v2043_v8, %v1351_v15 }
 0x63a   : > { %v1497_v21 = vmul.f32 %v2981_v16, %v2981_v16 }
 0x63b   : > { %v1356_v22 = vsel %vm1355_vm4, %v2043_v8, %v1352_v18 }
 0x63c   : > { %v1361_v23 = vsel %vm1358_vm5, %v1360_v20, %v1356_v22  ;;  %v1498_v19 = vsel %vm715_vm0, %v1497_v21, 0.0 }
 0x63d   : > { %v1362_v24 = vmul.f32 %v2958_v33, %v1361_v23  ;;  %v932_v25 = vpop.xlane.xlu1 %931  ;;  %1499 = vadd.xlane.f32.xlu1 %v1498_v19 }
 0x63e   : > { %2044 = vrcp.f32 %v932_v25  ;;  %v944_v30 = vand.u32 2147483648, %v932_v25  ;;  %v942_v32 = vand.u32 2147483647, %v932_v25  ;;  %vm938_vm7 = vweird.f32 %v932_v25 }
 0x63f   : > { %1852 = vst.msk [vmem:[%s2954_s15 + $0x18] sm:$0xff] %vm787_vm1, %v1362_v24 }
 0x640   : > { %v945_v37 = vor.u32 1.1754944e-38, %v944_v30  ;;  %vm943_vm9 = vcmp.eq.f32.partialorder %v942_v32, 8.507059e+37 }
 0x644   : > { %v2045_v26 = vpop.eup %2044 }
 0x645   : > { %v934_v27 = vmul.f32 %v2045_v26, %v932_v25  ;;  %v1237_v28 = vpop.xlane.xlu1 %1236  ;;  %vm939_vm6 = vweird.f32 %v2045_v26 }
 0x646   : > { %2046 = vrcp.f32 %v1237_v28  ;;  %vm940_vm8 = vmor %vm938_vm7, %vm939_vm6  ;;  %v1249_v44 = vand.u32 2147483648, %v1237_v28  ;;  %v1247_v47 = vand.u32 2147483647, %v1237_v28 }
 0x647   : > { %v935_v29 = vsub.f32 1.0, %v934_v27 }
 0x649   : > { %v936_v31 = vmul.f32 %v2045_v26, %v935_v29 }
 0x64b   : > { %v937_v33 = vadd.f32 %v2045_v26, %v936_v31 }
 0x64c   : > { %v2047_v35 = vpop.eup %2046 }
 0x64d   : > { %v941_v38 = vsel %vm940_vm8, %v2045_v26, %v937_v33  ;;  %v1239_v40 = vmul.f32 %v2047_v35, %v1237_v28  ;;  %vm1244_vm10 = vweird.f32 %v2047_v35 }
 0x64e   : > { %v946_v34 = vsel %vm943_vm9, %v945_v37, %v941_v38 }
 0x64f   : > { %v947_v41 = vmul.f32 %v2967_v36, %v946_v34  ;;  %v1240_v42 = vsub.f32 1.0, %v1239_v40 }
 0x651   : > { %1834 = vst.msk [vmem:[%s2938_s9 + $0x10] sm:$0xff] %vm787_vm1, %v947_v41  ;;  %v1241_v45 = vmul.f32 %v2047_v35, %v1240_v42  ;;  %s2340_s9 = scalar_lea.hbm %s3138_s8, 64 }
 0x652   : > { %p2342_p9 = scmp.lt.s32.totalorder %s2340_s9, %s2336_s19 }
 0x654   : > { %p2343_p8 = por %p2342_p9, %p2341_p7 }
 0x656   : > { %p2344_p10 = pnand %p2343_p8, %p2339_p13 }
 0x658   : > { %2347 = shalt.err (!%p2344_p10)
}
 0x659   : > { %s2481_s24 = smov 128   ;;  %s2482_s25 = smov 8   ;;  %v1242_v48 = vadd.f32 %v2047_v35, %v1241_v45  ;;  %vm1243_vm11 = vweird.f32 %v1237_v28  ;;  %v1250_v49 = vor.u32 1.1754944e-38, %v1249_v44  ;;  %vm1248_vm13 = vcmp.eq.f32.partialorder %v1247_v47, 8.507059e+37 }
 0x65a   : > { %1901 = dma.vmem_to_hbm [thread:$0]  (%p2686_p0), %s2994_s13, 512, %s1555_s6, %s3004_s0, %s2481_s24, %s2481_s24, %s2482_s25   ;;  %vm1245_vm12 = vmor %vm1243_vm11, %vm1244_vm10 }
 0x65b   : > { %s1571_s26 = sshll.u32 %s1568_s27, 4  ;;  %s1569_s7 = sshll.u32 %s2954_s15, 4  ;;  %v1246_v50 = vsel %vm1245_vm12, %v2047_v35, %v1242_v48  ;;  %s1572_s26 = int_to_ptr.hbm [resolvable:$true] %s1571_s26  ;;  %s1570_s7 = int_to_ptr.vmem [resolvable:$true] %s1569_s7 }
 0x65c   : > { %v1251_v51 = vsel %vm1248_vm13, %v1250_v49, %v1246_v50  ;;  %s2362_s30 = sshra.s32 %s1572_s26, 4  ;;  %s2368_s27 = scalar_lea.hbm %s3139_s16, 64  ;;  %s2363_s30 = int_to_ptr.hbm [resolvable:$true] %s2362_s30 }
 0x65d   : > { %v1252_v52 = vmul.f32 %v2974_v5, %v1251_v51  ;;  %s2364_s13 = scalar_lea.hbm %s2363_s30, 32  ;;  %p2369_p2 = scmp.lt.s32.totalorder %s2363_s30, %s3139_s16 }
 0x65e   : > { %p2365_p12 = scmp.ne.s32.totalorder %s2363_s30, %s2364_s13  ;;  %p2370_p4 = scmp.lt.s32.totalorder %s2368_s27, %s2364_s13 }
 0x65f   : > { %1846 = vst.msk [vmem:[%s2954_s15 + $0x8] sm:$0xff] %vm787_vm1, %v1252_v52 }
 0x660   : > { %p2366_p5 = pnand %p2365_p12, %p2686_p0  ;;  %p2371_p1 = por %p2370_p4, %p2369_p2 }
 0x662   : > { %p2367_p11 = pneg %p2366_p5 }
 0x664   : > { %p2372_p3 = pnand %p2371_p1, %p2367_p11 }
 0x666   : > { %2375 = shalt.err (!%p2372_p3)
}
 0x667   : > { %1902 = dma.vmem_to_hbm [thread:$0]  (%p2686_p0), %s1570_s7, 512, %s1572_s26, %s3004_s0, %s2481_s24, %s2481_s24, %s2482_s25  }
 0x668   : > { %s1859_s15 = sshll.u32 %s2592_s28, 3  ;;  %s3140_s5 = sld [smem:[#allocation42_spill]] }
 0x669   : > { %s694_s0 = scalar_lea.vmem [#allocation17], %s2742_s17  ;;  %s1516_s28 = scalar_lea.sflag [#allocation4], %s2739_s23 }
 0x66a   : > { %s1538_s24 = sshll.u32 %s694_s0, 4  ;;  %s1539_s24 = int_to_ptr.vmem [resolvable:$true] %s1538_s24 }
 0x66e   : > { %s1536_s30 = scalar_lea.hbm %s3140_s5, %s1859_s15  ;;  %s2396_s6 = scalar_lea.hbm %s3140_s5, 16 }
 0x66f   : > { %s1540_s25 = sshll.u32 %s1536_s30, 4  ;;  %s1541_s25 = int_to_ptr.hbm [resolvable:$true] %s1540_s25 }
 0x670   : > { %s2390_s26 = sshra.s32 %s1541_s25, 4  ;;  %s2391_s26 = int_to_ptr.hbm [resolvable:$true] %s2390_s26 }
 0x671   : > { %s2392_s7 = scalar_lea.hbm %s2391_s26, 8  ;;  %p2397_p8 = scmp.lt.s32.totalorder %s2391_s26, %s3140_s5 }
 0x672   : > { %p2393_p13 = scmp.ne.s32.totalorder %s2391_s26, %s2392_s7  ;;  %p2398_p10 = scmp.lt.s32.totalorder %s2396_s6, %s2392_s7 }
 0x674   : > { %p2394_p7 = pnand %p2393_p13, %p2686_p0  ;;  %p2399_p12 = por %p2398_p10, %p2397_p8 }
 0x676   : > { %p2395_p9 = pneg %p2394_p7 }
 0x678   : > { %p2400_p5 = pnand %p2399_p12, %p2395_p9 }
 0x6b0   : > { %v1500_v54 = vpop.xlane.xlu1 %1499 }
 0x6b1   : > { %v1501_v53 = vmul.f32 %v1500_v54, %v2824_v39 }
 0x6b3   : > { %v1502_v55 = vadd.f32 1e-05, %v1501_v53 }
 0x6b5   : > { %2048 = vrsqrt.f32 %v1502_v55  ;;  %vm1509_vm14 = vweird.f32 %v1502_v55 }
 0x6bb   : > { %v2049_v43 = vpop.eup %2048 }
 0x6bc   : > { %v1504_v56 = vmul.f32 %v2049_v43, %v1502_v55  ;;  %vm1510_vm1 = vweird.f32 %v2049_v43 }
 0x6bd   : > { %vm1511_vm15 = vmor %vm1509_vm14, %vm1510_vm1 }
 0x6be   : > { %v1505_v57 = vmul.f32 %v2049_v43, %v1504_v56 }
 0x6c0   : > { %v1506_v58 = vmul.f32 0.5, %v1505_v57 }
 0x6c2   : > { %v1507_v59 = vsub.f32 1.5, %v1506_v58 }
 0x6c4   : > { %v1508_v60 = vmul.f32 %v2049_v43, %v1507_v59 }
 0x6c6   : > { %v1512_v39 = vsel %vm1511_vm15, %v2049_v43, %v1508_v60 }
 0x6c7   : > { %v1513_v17 = vmul.f32 %v1512_v39, %v2981_v16 }
 0x6c9   : > { %1514 = vst.msk [vmem:[%s694_s0] sm:$0xff] %vm715_vm0, %v1513_v17 }
 0x6ca   : > { %2403 = shalt.err (!%p2400_p5)
}
 0x6cb   : > { %1900 = dma.vmem_to_hbm [thread:$0]  (%p2686_p0), %s1539_s24, 128, %s1541_s25, %s1516_s28  }
 0x6cc PF: > { %s3142_s10 = sld [smem:[#allocation30_spill]]  ;;  %s1586_s29 = sand.u32 1, %s2454_s21  }
 0x6cd   : > { %s1587_s15 = scalar_lea.sflag [#allocation4], %s1586_s29 }
 0x6d2   : > { %p3143_p11 = scmp.ge.s32.totalorder %s3142_s10, 2 }
 0x6d4   : > { %p1936_p2 = pnand %p3143_p11, %p2694_p6 }
 0x6d6   : > { %p1937_p4 = pneg %p1936_p2 }
 0x6d8   : > { %2445 = dma.done.wait (%p1937_p4), %s1587_s15, 128  }
 0x6d9   : > { %2447 = vsyncadd (%p1937_p4), %s1587_s15, 4294967168  ;;  %s3144_s9 = sadd.s32 4294967294, %s3142_s10  }
 0x6da   : > { %s1596_s20 = sand.u32 1, %s3144_s9  }
 0x6db   : > { %s1597_s30 = scalar_lea.sflag [#allocation19], %s1596_s20 }
 0x6dc   : > { %2449 = dma.done.wait (%p1937_p4), %s1597_s30, 1024  }
 0x6dd   : > { %2451 = vsyncadd (%p1937_p4), %s1597_s30, 4294966272  ;;  %s3145_s24 = sld [smem:[#allocation31_spill]]  ;;  %s3148_s21 = smov %s2458_s22 }
 0x6de   : > { %s3146_s18 = sld [smem:[#allocation29_spill]] }
 0x6df   : > { %s3147_s23 = sld [smem:[#allocation32_spill]] }
 0x6e3   : > { %p39_p0 = scmp.ge.s32.totalorder %s3145_s24, 4  }
 0x6e4   : > { %s3149_s22 = smov %s3146_s18 }
 0x6e5   :  { %41 = sbr.rel (!%p39_p0) target bundleno = 24 (0x18), region = 200 }
 0x6ea   :  { %1613 = vsyncpa [#allocation3], 1 }
 0x6eb   :  { %1615 = vsyncpa [#allocation3 + $0x1], 1 }
 0x6ec   :  { %1616 = vsyncpa [#allocation6], 1 }
 0x6ed   :  { %1618 = vsyncpa [#allocation6 + $0x1], 1 }
 0x6ee   :  { %1619 = vsyncpa [#allocation9], 1 }
 0x6ef   :  { %1620 = vsyncpa [#allocation12], 1 }
 0x6f0   :  { %1621 = vsyncpa [#allocation15], 1 }
 0x6f1   :  { %1622 = vsyncpa [#allocation4], 1 }
 0x6f2   :  { %1624 = vsyncpa [#allocation4 + $0x1], 1 }
 0x6f3   :  { %1625 = vsyncpa [#allocation19], 1 }
 0x6f4   :  { %1627 = vsyncpa [#allocation19 + $0x1], 1 }

</bundles_post_ra>
